<compile_context>
chip_gen: v6e
topology: v6e:2x2x1
jax: 0.10.0
libtpu: 0.0.40
codegen_flags: <defaults>
</compile_context>

<pallas_src>
import jax
import jax.numpy as jnp
from jax.experimental import pallas as pl
from jax.experimental.pallas import tpu as pltpu


class Opt:
    vocab_size = 50
    story_size = 5
    word_embed_dim = 32
    hidden_dim = 32
    num_layers = 1
    rnn_type = "gru"
    dropout = 0.0          # eval mode -> dropout is identity
    seq_length = 8
    feat_size = 64
    caption = False


# ----------------------------------------------------------------------------
# Pallas kernel: GRU recurrence + batched logit MLP / log_softmax.
# ----------------------------------------------------------------------------
def decoder_kernel(gir_ref, giz_ref, gin_ref, h0_ref, whh_ref, bhhn_ref,
                   w1_ref, b1_ref, w2_ref, b2_ref, out_ref, hbuf_ref):
    L, Np, H = gir_ref.shape
    H2 = w1_ref.shape[1]
    Vp = w2_ref.shape[1]
    LN = L * Np

    # Loop-invariant loads / broadcasts, hoisted once (JAX does not CSE them).
    whh_r = whh_ref[0]                                # (H, H)
    whh_z = whh_ref[1]
    whh_n = whh_ref[2]
    bhh_n = jnp.broadcast_to(bhhn_ref[...], (Np, H))

    h = h0_ref[...]                                   # (Np, H)

    # Static unroll of the short recurrence.  Only h @ W_hh_* sits on the
    # serial dependency chain; everything input-side lives in gi*_ref already
    # (b_ih and the r/z parts of b_hh are folded in; only b_hh_n stays here
    # because it sits inside the r * (.) term).
    for t in range(L):
        gh_r = jnp.dot(h, whh_r, preferred_element_type=jnp.float32)
        gh_z = jnp.dot(h, whh_z, preferred_element_type=jnp.float32)
        gh_n = jnp.dot(h, whh_n, preferred_element_type=jnp.float32) + bhh_n
        r = jax.nn.sigmoid(gir_ref[t] + gh_r)
        z = jax.nn.sigmoid(giz_ref[t] + gh_z)
        n = jnp.tanh(gin_ref[t] + r * gh_n)
        h = (1.0 - z) * n + z * h
        hbuf_ref[pl.ds(t * Np, Np), :] = h            # tile-aligned stash (16 rows)

    # Batched output head over all L*Np rows at once (replaces 8 tiny per-step
    # matmuls + 8 softmaxes + 8 masked partial stores).
    hcat = hbuf_ref[...]                              # (L*Np, H)
    hid = jnp.tanh(
        jnp.dot(hcat, w1_ref[...], preferred_element_type=jnp.float32)
        + jnp.broadcast_to(b1_ref[...], (LN, H2)))
    logits = (jnp.dot(hid, w2_ref[...], preferred_element_type=jnp.float32)
              + jnp.broadcast_to(b2_ref[...], (LN, Vp)))
    m = jnp.max(logits, axis=-1, keepdims=True)
    lse = jnp.log(jnp.sum(jnp.exp(logits - m), axis=-1, keepdims=True)) + m
    out_ref[...] = logits - lse                       # one dense (128,128) store


# ----------------------------------------------------------------------------
# Wrapper: teacher-forced input-side precompute + padding in plain JAX.
# ----------------------------------------------------------------------------
def base_model_forward(params, features, story_t, opt):
    B = features.shape[0]
    S, L = opt.story_size, opt.seq_length
    E, H, V, F = opt.word_embed_dim, opt.hidden_dim, opt.vocab_size, opt.feat_size
    H2 = H // 2
    N = B * S
    Np = ((N + 7) // 8) * 8                  # sublane-dense padded batch rows
    Vp = pl.cdiv(V, 128) * 128               # lane-dense padded vocab width

    feat_flat = features.reshape(N, F).astype(jnp.float32)

    # TODO(synk): VisualEncoder lives in a separate file and is not defined in
    # BaseModel.py; stand it in with a deterministic linear feat_size -> E.
    out_e = feat_flat @ params["W_enc"] + params["b_enc"]        # (N, E)

    # Time-invariant precompute hoisted out of the recurrence.
    x_v = out_e @ params["W_d_v"] + params["b_d"]                # (N, E)
    h0 = feat_flat @ params["W_s"] + params["b_s"]               # (N, H)

    story_flat = story_t.reshape(N, L).astype(jnp.int32)
    # Teacher forcing: word fed at step t is 0 (BOS) for t==0 else story_t[:, t-1].
    words = jnp.concatenate(
        [jnp.zeros((N, 1), jnp.int32), story_flat[:, : L - 1]], axis=1)   # (N, L)
    words = jnp.transpose(words, (1, 0))                                  # (L, N)
    # TODO(synk): the data-dependent early `break` on story_t[:, i].sum()==0 is
    # not expressible as a static loop bound; full seq_length is always executed.

    emb = params["W_emb"][words]                                 # (L, N, E)
    x_all = emb @ params["W_d_w"] + x_v[None]                    # (L, N, E)

    # Input-side GRU gate pre-activations for all timesteps (b_ih fully folded;
    # b_hh_r / b_hh_z folded too since they sit outside the r*(.) term).
    gi_r = x_all @ params["W_ih"][0] + params["b_ih"][0] + params["b_hh"][0]
    gi_z = x_all @ params["W_ih"][1] + params["b_ih"][1] + params["b_hh"][1]
    gi_n = x_all @ params["W_ih"][2] + params["b_ih"][2]

    padN = lambda a: jnp.pad(a, ((0, 0), (0, Np - N), (0, 0)))
    gi_r, gi_z, gi_n = padN(gi_r), padN(gi_z), padN(gi_n)        # (L, Np, H)
    h0p = jnp.pad(h0, ((0, Np - N), (0, 0)))                     # (Np, H)

    # Lane-dense logits: pad vocab to a multiple of 128; padded columns get a
    # very negative bias so they never win the max nor contribute to the sum.
    W2p = jnp.zeros((H2, Vp), jnp.float32).at[:, :V].set(params["W_2"])
    b2p = jnp.full((1, Vp), -1e9, jnp.float32).at[:, :V].set(params["b_2"])

    vmem_spec = pl.BlockSpec(memory_space=pltpu.MemorySpace.VMEM)
    out = pl.pallas_call(
        decoder_kernel,
        out_shape=jax.ShapeDtypeStruct((L * Np, Vp), jnp.float32),
        in_specs=[vmem_spec] * 10,
        out_specs=vmem_spec,
        scratch_shapes=[pltpu.VMEM((L * Np, H), jnp.float32)],
    )(gi_r, gi_z, gi_n, h0p, params["W_hh"], params["b_hh"][2],
      params["W_1"], params["b_1"], W2p, b2p)

    # (L*Np, Vp) -> (L, Np, Vp) -> slice real rows/vocab -> (N, L, V) -> 4D.
    out = out.reshape(L, Np, Vp)[:, :N, :V]
    return jnp.transpose(out, (1, 0, 2)).reshape(B, S, L, V)


# ----------------------------------------------------------------------------
# Deterministic parameter init (mirrors init_weights: Linear/Embedding
# uniform(-0.1, 0.1), biases zero; GRU keeps its default uniform(-1/sqrt(H))).
# ----------------------------------------------------------------------------
def init_params(key, opt):
    E, H, V, F = opt.word_embed_dim, opt.hidden_dim, opt.vocab_size, opt.feat_size
    H2 = H // 2
    ks = jax.random.split(key, 12)

    def u(k, shape, r):
        return jax.random.uniform(k, shape, jnp.float32, -r, r)

    kg = 1.0 / (H ** 0.5)
    p = {
        "W_enc": u(ks[0], (F, E), 0.1), "b_enc": jnp.zeros((1, E), jnp.float32),
        "W_s":   u(ks[1], (F, H), 0.1), "b_s":   jnp.zeros((1, H), jnp.float32),
        "W_emb": u(ks[2], (V, E), 0.1),
        "W_d_w": u(ks[3], (E, E), 0.1),
        "W_d_v": u(ks[4], (E, E), 0.1),
        "b_d":   jnp.zeros((1, E), jnp.float32),
        "W_ih":  u(ks[5], (3, E, H), kg),
        "b_ih":  u(ks[6], (3, 1, H), kg),
        "W_hh":  u(ks[7], (3, H, H), kg),
        "b_hh":  u(ks[8], (3, 1, H), kg),
        "W_1":   u(ks[9], (H, H2), 0.1), "b_1": jnp.zeros((1, H2), jnp.float32),
        "W_2":   u(ks[10], (H2, V), 0.1), "b_2": jnp.zeros((1, V), jnp.float32),
    }
    return p


# ----------------------------------------------------------------------------
# Pure-JAX reference (unfused params, same math) for a correctness check.
# ----------------------------------------------------------------------------
def reference_forward(params, features, story_t, opt):
    B = features.shape[0]
    S, L, V = opt.story_size, opt.seq_length, opt.vocab_size
    N = B * S
    feat = features.reshape(N, opt.feat_size).astype(jnp.float32)
    out_e = feat @ params["W_enc"] + params["b_enc"]
    story = story_t.reshape(N, L).astype(jnp.int32)
    h = feat @ params["W_s"] + params["b_s"]
    last_word = jnp.zeros((N,), jnp.int32)
    outs = []
    for i in range(L):
        emb = params["W_emb"][last_word]
        x = emb @ params["W_d_w"] + out_e @ params["W_d_v"] + params["b_d"]
        r = jax.nn.sigmoid(x @ params["W_ih"][0] + params["b_ih"][0]
                           + h @ params["W_hh"][0] + params["b_hh"][0])
        z = jax.nn.sigmoid(x @ params["W_ih"][1] + params["b_ih"][1]
                           + h @ params["W_hh"][1] + params["b_hh"][1])
        n = jnp.tanh(x @ params["W_ih"][2] + params["b_ih"][2]
                     + r * (h @ params["W_hh"][2] + params["b_hh"][2]))
        h = (1.0 - z) * n + z * h
        hid = jnp.tanh(h @ params["W_1"] + params["b_1"])
        logits = hid @ params["W_2"] + params["b_2"]
        outs.append(jax.nn.log_softmax(logits, axis=-1))
        last_word = story[:, i]
    return jnp.stack(outs, axis=1).reshape(B, S, L, V)


if __name__ == "__main__":
    opt = Opt()
    key = jax.random.PRNGKey(0)
    kp, kf, ks = jax.random.split(key, 3)
    params = init_params(kp, opt)

    B = 2
    features = jax.random.normal(
        kf, (B, opt.story_size, opt.feat_size), jnp.float32)
    story_t = jax.random.randint(
        ks, (B, opt.story_size, opt.seq_length), 1, opt.vocab_size).astype(jnp.int32)

    out = base_model_forward(params, features, story_t, opt)
    out = jax.block_until_ready(out)

    assert out.shape == (B, opt.story_size, opt.seq_length, opt.vocab_size)
    ref = reference_forward(params, features, story_t, opt)
    assert jnp.allclose(out, ref, atol=1e-4, rtol=1e-4), "mismatch vs reference"
    print("KERNEL_OK")
</pallas_src>

<mosaic_0001>
module attributes {stable_mosaic.version = 11 : i64} {
  func.func @decoder_kernel(%arg0: memref<8x16x32xf32, #tpu.memory_space<vmem>>, %arg1: memref<8x16x32xf32, #tpu.memory_space<vmem>>, %arg2: memref<8x16x32xf32, #tpu.memory_space<vmem>>, %arg3: memref<16x32xf32, #tpu.memory_space<vmem>>, %arg4: memref<3x32x32xf32, #tpu.memory_space<vmem>>, %arg5: memref<1x32xf32, #tpu.memory_space<vmem>>, %arg6: memref<32x16xf32, #tpu.memory_space<vmem>>, %arg7: memref<1x16xf32, #tpu.memory_space<vmem>>, %arg8: memref<16x128xf32, #tpu.memory_space<vmem>>, %arg9: memref<1x128xf32, #tpu.memory_space<vmem>>, %arg10: memref<128x128xf32, #tpu.memory_space<vmem>>, %arg11: memref<128x32xf32, #tpu.memory_space<vmem>>) attributes {dimension_semantics = [], scalar_prefetch = 0 : i64, scratch_operands = 1 : i64, tpu.core_type = #tpu.core_type<tc>} {
    %c0 = arith.constant 0 : index
    %c0_0 = arith.constant 0 : index
    %c0_1 = arith.constant 0 : index
    %0 = vector.load %arg4[%c0, %c0_0, %c0_1] : memref<3x32x32xf32, #tpu.memory_space<vmem>>, vector<1x32x32xf32>
    %1 = vector.shape_cast %0 : vector<1x32x32xf32> to vector<32x32xf32>
    %c1 = arith.constant 1 : index
    %c0_2 = arith.constant 0 : index
    %c0_3 = arith.constant 0 : index
    %2 = vector.load %arg4[%c1, %c0_2, %c0_3] : memref<3x32x32xf32, #tpu.memory_space<vmem>>, vector<1x32x32xf32>
    %3 = vector.shape_cast %2 : vector<1x32x32xf32> to vector<32x32xf32>
    %c2 = arith.constant 2 : index
    %c0_4 = arith.constant 0 : index
    %c0_5 = arith.constant 0 : index
    %4 = vector.load %arg4[%c2, %c0_4, %c0_5] : memref<3x32x32xf32, #tpu.memory_space<vmem>>, vector<1x32x32xf32>
    %5 = vector.shape_cast %4 : vector<1x32x32xf32> to vector<32x32xf32>
    %c0_6 = arith.constant 0 : index
    %c0_7 = arith.constant 0 : index
    %6 = vector.load %arg5[%c0_6, %c0_7] : memref<1x32xf32, #tpu.memory_space<vmem>>, vector<1x32xf32>
    %7 = vector.shape_cast %6 : vector<1x32xf32> to vector<1x32xf32>
    %8 = vector.broadcast %7 : vector<1x32xf32> to vector<16x32xf32>
    %c0_8 = arith.constant 0 : index
    %c0_9 = arith.constant 0 : index
    %9 = vector.load %arg3[%c0_8, %c0_9] : memref<16x32xf32, #tpu.memory_space<vmem>>, vector<16x32xf32>
    %cst = arith.constant dense<0.000000e+00> : vector<16x32xf32>
    %10 = tpu.matmul %9, %1, %cst {dimension_numbers = #tpu.dot_dimension_numbers<[1], [0], [0], [1], [0, 0, 1, 1], [], []>} : vector<16x32xf32>, vector<32x32xf32>, vector<16x32xf32> -> vector<16x32xf32>
    %cst_10 = arith.constant dense<0.000000e+00> : vector<16x32xf32>
    %11 = tpu.matmul %9, %3, %cst_10 {dimension_numbers = #tpu.dot_dimension_numbers<[1], [0], [0], [1], [0, 0, 1, 1], [], []>} : vector<16x32xf32>, vector<32x32xf32>, vector<16x32xf32> -> vector<16x32xf32>
    %cst_11 = arith.constant dense<0.000000e+00> : vector<16x32xf32>
    %12 = tpu.matmul %9, %5, %cst_11 {dimension_numbers = #tpu.dot_dimension_numbers<[1], [0], [0], [1], [0, 0, 1, 1], [], []>} : vector<16x32xf32>, vector<32x32xf32>, vector<16x32xf32> -> vector<16x32xf32>
    %13 = arith.addf %12, %8 : vector<16x32xf32>
    %c0_12 = arith.constant 0 : index
    %c0_13 = arith.constant 0 : index
    %c0_14 = arith.constant 0 : index
    %14 = vector.load %arg0[%c0_12, %c0_13, %c0_14] : memref<8x16x32xf32, #tpu.memory_space<vmem>>, vector<1x16x32xf32>
    %15 = vector.shape_cast %14 : vector<1x16x32xf32> to vector<16x32xf32>
    %16 = arith.addf %15, %10 : vector<16x32xf32>
    %17 = arith.negf %16 : vector<16x32xf32>
    %18 = math.exp %17 : vector<16x32xf32>
    %cst_15 = arith.constant 1.000000e+00 : f32
    %19 = vector.broadcast %cst_15 : f32 to vector<16x32xf32>
    %20 = arith.addf %19, %18 : vector<16x32xf32>
    %21 = arith.divf %19, %20 : vector<16x32xf32>
    %c0_16 = arith.constant 0 : index
    %c0_17 = arith.constant 0 : index
    %c0_18 = arith.constant 0 : index
    %22 = vector.load %arg1[%c0_16, %c0_17, %c0_18] : memref<8x16x32xf32, #tpu.memory_space<vmem>>, vector<1x16x32xf32>
    %23 = vector.shape_cast %22 : vector<1x16x32xf32> to vector<16x32xf32>
    %24 = arith.addf %23, %11 : vector<16x32xf32>
    %25 = arith.negf %24 : vector<16x32xf32>
    %26 = math.exp %25 : vector<16x32xf32>
    %cst_19 = arith.constant 1.000000e+00 : f32
    %27 = vector.broadcast %cst_19 : f32 to vector<16x32xf32>
    %28 = arith.addf %27, %26 : vector<16x32xf32>
    %29 = arith.divf %27, %28 : vector<16x32xf32>
    %c0_20 = arith.constant 0 : index
    %c0_21 = arith.constant 0 : index
    %c0_22 = arith.constant 0 : index
    %30 = vector.load %arg2[%c0_20, %c0_21, %c0_22] : memref<8x16x32xf32, #tpu.memory_space<vmem>>, vector<1x16x32xf32>
    %31 = vector.shape_cast %30 : vector<1x16x32xf32> to vector<16x32xf32>
    %32 = arith.mulf %21, %13 : vector<16x32xf32>
    %33 = arith.addf %31, %32 : vector<16x32xf32>
    %34 = math.tanh %33 : vector<16x32xf32>
    %cst_23 = arith.constant 1.000000e+00 : f32
    %35 = vector.broadcast %cst_23 : f32 to vector<16x32xf32>
    %36 = arith.subf %35, %29 : vector<16x32xf32>
    %37 = arith.mulf %36, %34 : vector<16x32xf32>
    %38 = arith.mulf %29, %9 : vector<16x32xf32>
    %39 = arith.addf %37, %38 : vector<16x32xf32>
    %c0_24 = arith.constant 0 : index
    %c0_25 = arith.constant 0 : index
    %40 = vector.load %arg11[%c0_24, %c0_25] : memref<128x32xf32, #tpu.memory_space<vmem>>, vector<16x32xf32>
    tpu.vector_store %arg11[%c0_24, %c0_25], %39 {strides = array<i32>} : memref<128x32xf32, #tpu.memory_space<vmem>>, vector<16x32xf32>,
    %cst_26 = arith.constant dense<0.000000e+00> : vector<16x32xf32>
    %41 = tpu.matmul %39, %1, %cst_26 {dimension_numbers = #tpu.dot_dimension_numbers<[1], [0], [0], [1], [0, 0, 1, 1], [], []>} : vector<16x32xf32>, vector<32x32xf32>, vector<16x32xf32> -> vector<16x32xf32>
    %cst_27 = arith.constant dense<0.000000e+00> : vector<16x32xf32>
    %42 = tpu.matmul %39, %3, %cst_27 {dimension_numbers = #tpu.dot_dimension_numbers<[1], [0], [0], [1], [0, 0, 1, 1], [], []>} : vector<16x32xf32>, vector<32x32xf32>, vector<16x32xf32> -> vector<16x32xf32>
    %cst_28 = arith.constant dense<0.000000e+00> : vector<16x32xf32>
    %43 = tpu.matmul %39, %5, %cst_28 {dimension_numbers = #tpu.dot_dimension_numbers<[1], [0], [0], [1], [0, 0, 1, 1], [], []>} : vector<16x32xf32>, vector<32x32xf32>, vector<16x32xf32> -> vector<16x32xf32>
    %44 = arith.addf %43, %8 : vector<16x32xf32>
    %c1_29 = arith.constant 1 : index
    %c0_30 = arith.constant 0 : index
    %c0_31 = arith.constant 0 : index
    %45 = vector.load %arg0[%c1_29, %c0_30, %c0_31] : memref<8x16x32xf32, #tpu.memory_space<vmem>>, vector<1x16x32xf32>
    %46 = vector.shape_cast %45 : vector<1x16x32xf32> to vector<16x32xf32>
    %47 = arith.addf %46, %41 : vector<16x32xf32>
    %48 = arith.negf %47 : vector<16x32xf32>
    %49 = math.exp %48 : vector<16x32xf32>
    %cst_32 = arith.constant 1.000000e+00 : f32
    %50 = vector.broadcast %cst_32 : f32 to vector<16x32xf32>
    %51 = arith.addf %50, %49 : vector<16x32xf32>
    %52 = arith.divf %50, %51 : vector<16x32xf32>
    %c1_33 = arith.constant 1 : index
    %c0_34 = arith.constant 0 : index
    %c0_35 = arith.constant 0 : index
    %53 = vector.load %arg1[%c1_33, %c0_34, %c0_35] : memref<8x16x32xf32, #tpu.memory_space<vmem>>, vector<1x16x32xf32>
    %54 = vector.shape_cast %53 : vector<1x16x32xf32> to vector<16x32xf32>
    %55 = arith.addf %54, %42 : vector<16x32xf32>
    %56 = arith.negf %55 : vector<16x32xf32>
    %57 = math.exp %56 : vector<16x32xf32>
    %cst_36 = arith.constant 1.000000e+00 : f32
    %58 = vector.broadcast %cst_36 : f32 to vector<16x32xf32>
    %59 = arith.addf %58, %57 : vector<16x32xf32>
    %60 = arith.divf %58, %59 : vector<16x32xf32>
    %c1_37 = arith.constant 1 : index
    %c0_38 = arith.constant 0 : index
    %c0_39 = arith.constant 0 : index
    %61 = vector.load %arg2[%c1_37, %c0_38, %c0_39] : memref<8x16x32xf32, #tpu.memory_space<vmem>>, vector<1x16x32xf32>
    %62 = vector.shape_cast %61 : vector<1x16x32xf32> to vector<16x32xf32>
    %63 = arith.mulf %52, %44 : vector<16x32xf32>
    %64 = arith.addf %62, %63 : vector<16x32xf32>
    %65 = math.tanh %64 : vector<16x32xf32>
    %cst_40 = arith.constant 1.000000e+00 : f32
    %66 = vector.broadcast %cst_40 : f32 to vector<16x32xf32>
    %67 = arith.subf %66, %60 : vector<16x32xf32>
    %68 = arith.mulf %67, %65 : vector<16x32xf32>
    %69 = arith.mulf %60, %39 : vector<16x32xf32>
    %70 = arith.addf %68, %69 : vector<16x32xf32>
    %c16 = arith.constant 16 : index
    %c0_41 = arith.constant 0 : index
    %71 = vector.load %arg11[%c16, %c0_41] : memref<128x32xf32, #tpu.memory_space<vmem>>, vector<16x32xf32>
    tpu.vector_store %arg11[%c16, %c0_41], %70 {strides = array<i32>} : memref<128x32xf32, #tpu.memory_space<vmem>>, vector<16x32xf32>,
    %cst_42 = arith.constant dense<0.000000e+00> : vector<16x32xf32>
    %72 = tpu.matmul %70, %1, %cst_42 {dimension_numbers = #tpu.dot_dimension_numbers<[1], [0], [0], [1], [0, 0, 1, 1], [], []>} : vector<16x32xf32>, vector<32x32xf32>, vector<16x32xf32> -> vector<16x32xf32>
    %cst_43 = arith.constant dense<0.000000e+00> : vector<16x32xf32>
    %73 = tpu.matmul %70, %3, %cst_43 {dimension_numbers = #tpu.dot_dimension_numbers<[1], [0], [0], [1], [0, 0, 1, 1], [], []>} : vector<16x32xf32>, vector<32x32xf32>, vector<16x32xf32> -> vector<16x32xf32>
    %cst_44 = arith.constant dense<0.000000e+00> : vector<16x32xf32>
    %74 = tpu.matmul %70, %5, %cst_44 {dimension_numbers = #tpu.dot_dimension_numbers<[1], [0], [0], [1], [0, 0, 1, 1], [], []>} : vector<16x32xf32>, vector<32x32xf32>, vector<16x32xf32> -> vector<16x32xf32>
    %75 = arith.addf %74, %8 : vector<16x32xf32>
    %c2_45 = arith.constant 2 : index
    %c0_46 = arith.constant 0 : index
    %c0_47 = arith.constant 0 : index
    %76 = vector.load %arg0[%c2_45, %c0_46, %c0_47] : memref<8x16x32xf32, #tpu.memory_space<vmem>>, vector<1x16x32xf32>
    %77 = vector.shape_cast %76 : vector<1x16x32xf32> to vector<16x32xf32>
    %78 = arith.addf %77, %72 : vector<16x32xf32>
    %79 = arith.negf %78 : vector<16x32xf32>
    %80 = math.exp %79 : vector<16x32xf32>
    %cst_48 = arith.constant 1.000000e+00 : f32
    %81 = vector.broadcast %cst_48 : f32 to vector<16x32xf32>
    %82 = arith.addf %81, %80 : vector<16x32xf32>
    %83 = arith.divf %81, %82 : vector<16x32xf32>
    %c2_49 = arith.constant 2 : index
    %c0_50 = arith.constant 0 : index
    %c0_51 = arith.constant 0 : index
    %84 = vector.load %arg1[%c2_49, %c0_50, %c0_51] : memref<8x16x32xf32, #tpu.memory_space<vmem>>, vector<1x16x32xf32>
    %85 = vector.shape_cast %84 : vector<1x16x32xf32> to vector<16x32xf32>
    %86 = arith.addf %85, %73 : vector<16x32xf32>
    %87 = arith.negf %86 : vector<16x32xf32>
    %88 = math.exp %87 : vector<16x32xf32>
    %cst_52 = arith.constant 1.000000e+00 : f32
    %89 = vector.broadcast %cst_52 : f32 to vector<16x32xf32>
    %90 = arith.addf %89, %88 : vector<16x32xf32>
    %91 = arith.divf %89, %90 : vector<16x32xf32>
    %c2_53 = arith.constant 2 : index
    %c0_54 = arith.constant 0 : index
    %c0_55 = arith.constant 0 : index
    %92 = vector.load %arg2[%c2_53, %c0_54, %c0_55] : memref<8x16x32xf32, #tpu.memory_space<vmem>>, vector<1x16x32xf32>
    %93 = vector.shape_cast %92 : vector<1x16x32xf32> to vector<16x32xf32>
    %94 = arith.mulf %83, %75 : vector<16x32xf32>
    %95 = arith.addf %93, %94 : vector<16x32xf32>
    %96 = math.tanh %95 : vector<16x32xf32>
    %cst_56 = arith.constant 1.000000e+00 : f32
    %97 = vector.broadcast %cst_56 : f32 to vector<16x32xf32>
    %98 = arith.subf %97, %91 : vector<16x32xf32>
    %99 = arith.mulf %98, %96 : vector<16x32xf32>
    %100 = arith.mulf %91, %70 : vector<16x32xf32>
    %101 = arith.addf %99, %100 : vector<16x32xf32>
    %c32 = arith.constant 32 : index
    %c0_57 = arith.constant 0 : index
    %102 = vector.load %arg11[%c32, %c0_57] : memref<128x32xf32, #tpu.memory_space<vmem>>, vector<16x32xf32>
    tpu.vector_store %arg11[%c32, %c0_57], %101 {strides = array<i32>} : memref<128x32xf32, #tpu.memory_space<vmem>>, vector<16x32xf32>,
    %cst_58 = arith.constant dense<0.000000e+00> : vector<16x32xf32>
    %103 = tpu.matmul %101, %1, %cst_58 {dimension_numbers = #tpu.dot_dimension_numbers<[1], [0], [0], [1], [0, 0, 1, 1], [], []>} : vector<16x32xf32>, vector<32x32xf32>, vector<16x32xf32> -> vector<16x32xf32>
    %cst_59 = arith.constant dense<0.000000e+00> : vector<16x32xf32>
    %104 = tpu.matmul %101, %3, %cst_59 {dimension_numbers = #tpu.dot_dimension_numbers<[1], [0], [0], [1], [0, 0, 1, 1], [], []>} : vector<16x32xf32>, vector<32x32xf32>, vector<16x32xf32> -> vector<16x32xf32>
    %cst_60 = arith.constant dense<0.000000e+00> : vector<16x32xf32>
    %105 = tpu.matmul %101, %5, %cst_60 {dimension_numbers = #tpu.dot_dimension_numbers<[1], [0], [0], [1], [0, 0, 1, 1], [], []>} : vector<16x32xf32>, vector<32x32xf32>, vector<16x32xf32> -> vector<16x32xf32>
    %106 = arith.addf %105, %8 : vector<16x32xf32>
    %c3 = arith.constant 3 : index
    %c0_61 = arith.constant 0 : index
    %c0_62 = arith.constant 0 : index
    %107 = vector.load %arg0[%c3, %c0_61, %c0_62] : memref<8x16x32xf32, #tpu.memory_space<vmem>>, vector<1x16x32xf32>
    %108 = vector.shape_cast %107 : vector<1x16x32xf32> to vector<16x32xf32>
    %109 = arith.addf %108, %103 : vector<16x32xf32>
    %110 = arith.negf %109 : vector<16x32xf32>
    %111 = math.exp %110 : vector<16x32xf32>
    %cst_63 = arith.constant 1.000000e+00 : f32
    %112 = vector.broadcast %cst_63 : f32 to vector<16x32xf32>
    %113 = arith.addf %112, %111 : vector<16x32xf32>
    %114 = arith.divf %112, %113 : vector<16x32xf32>
    %c3_64 = arith.constant 3 : index
    %c0_65 = arith.constant 0 : index
    %c0_66 = arith.constant 0 : index
    %115 = vector.load %arg1[%c3_64, %c0_65, %c0_66] : memref<8x16x32xf32, #tpu.memory_space<vmem>>, vector<1x16x32xf32>
    %116 = vector.shape_cast %115 : vector<1x16x32xf32> to vector<16x32xf32>
    %117 = arith.addf %116, %104 : vector<16x32xf32>
    %118 = arith.negf %117 : vector<16x32xf32>
    %119 = math.exp %118 : vector<16x32xf32>
    %cst_67 = arith.constant 1.000000e+00 : f32
    %120 = vector.broadcast %cst_67 : f32 to vector<16x32xf32>
    %121 = arith.addf %120, %119 : vector<16x32xf32>
    %122 = arith.divf %120, %121 : vector<16x32xf32>
    %c3_68 = arith.constant 3 : index
    %c0_69 = arith.constant 0 : index
    %c0_70 = arith.constant 0 : index
    %123 = vector.load %arg2[%c3_68, %c0_69, %c0_70] : memref<8x16x32xf32, #tpu.memory_space<vmem>>, vector<1x16x32xf32>
    %124 = vector.shape_cast %123 : vector<1x16x32xf32> to vector<16x32xf32>
    %125 = arith.mulf %114, %106 : vector<16x32xf32>
    %126 = arith.addf %124, %125 : vector<16x32xf32>
    %127 = math.tanh %126 : vector<16x32xf32>
    %cst_71 = arith.constant 1.000000e+00 : f32
    %128 = vector.broadcast %cst_71 : f32 to vector<16x32xf32>
    %129 = arith.subf %128, %122 : vector<16x32xf32>
    %130 = arith.mulf %129, %127 : vector<16x32xf32>
    %131 = arith.mulf %122, %101 : vector<16x32xf32>
    %132 = arith.addf %130, %131 : vector<16x32xf32>
    %c48 = arith.constant 48 : index
    %c0_72 = arith.constant 0 : index
    %133 = vector.load %arg11[%c48, %c0_72] : memref<128x32xf32, #tpu.memory_space<vmem>>, vector<16x32xf32>
    tpu.vector_store %arg11[%c48, %c0_72], %132 {strides = array<i32>} : memref<128x32xf32, #tpu.memory_space<vmem>>, vector<16x32xf32>,
    %cst_73 = arith.constant dense<0.000000e+00> : vector<16x32xf32>
    %134 = tpu.matmul %132, %1, %cst_73 {dimension_numbers = #tpu.dot_dimension_numbers<[1], [0], [0], [1], [0, 0, 1, 1], [], []>} : vector<16x32xf32>, vector<32x32xf32>, vector<16x32xf32> -> vector<16x32xf32>
    %cst_74 = arith.constant dense<0.000000e+00> : vector<16x32xf32>
    %135 = tpu.matmul %132, %3, %cst_74 {dimension_numbers = #tpu.dot_dimension_numbers<[1], [0], [0], [1], [0, 0, 1, 1], [], []>} : vector<16x32xf32>, vector<32x32xf32>, vector<16x32xf32> -> vector<16x32xf32>
    %cst_75 = arith.constant dense<0.000000e+00> : vector<16x32xf32>
    %136 = tpu.matmul %132, %5, %cst_75 {dimension_numbers = #tpu.dot_dimension_numbers<[1], [0], [0], [1], [0, 0, 1, 1], [], []>} : vector<16x32xf32>, vector<32x32xf32>, vector<16x32xf32> -> vector<16x32xf32>
    %137 = arith.addf %136, %8 : vector<16x32xf32>
    %c4 = arith.constant 4 : index
    %c0_76 = arith.constant 0 : index
    %c0_77 = arith.constant 0 : index
    %138 = vector.load %arg0[%c4, %c0_76, %c0_77] : memref<8x16x32xf32, #tpu.memory_space<vmem>>, vector<1x16x32xf32>
    %139 = vector.shape_cast %138 : vector<1x16x32xf32> to vector<16x32xf32>
    %140 = arith.addf %139, %134 : vector<16x32xf32>
    %141 = arith.negf %140 : vector<16x32xf32>
    %142 = math.exp %141 : vector<16x32xf32>
    %cst_78 = arith.constant 1.000000e+00 : f32
    %143 = vector.broadcast %cst_78 : f32 to vector<16x32xf32>
    %144 = arith.addf %143, %142 : vector<16x32xf32>
    %145 = arith.divf %143, %144 : vector<16x32xf32>
    %c4_79 = arith.constant 4 : index
    %c0_80 = arith.constant 0 : index
    %c0_81 = arith.constant 0 : index
    %146 = vector.load %arg1[%c4_79, %c0_80, %c0_81] : memref<8x16x32xf32, #tpu.memory_space<vmem>>, vector<1x16x32xf32>
    %147 = vector.shape_cast %146 : vector<1x16x32xf32> to vector<16x32xf32>
    %148 = arith.addf %147, %135 : vector<16x32xf32>
    %149 = arith.negf %148 : vector<16x32xf32>
    %150 = math.exp %149 : vector<16x32xf32>
    %cst_82 = arith.constant 1.000000e+00 : f32
    %151 = vector.broadcast %cst_82 : f32 to vector<16x32xf32>
    %152 = arith.addf %151, %150 : vector<16x32xf32>
    %153 = arith.divf %151, %152 : vector<16x32xf32>
    %c4_83 = arith.constant 4 : index
    %c0_84 = arith.constant 0 : index
    %c0_85 = arith.constant 0 : index
    %154 = vector.load %arg2[%c4_83, %c0_84, %c0_85] : memref<8x16x32xf32, #tpu.memory_space<vmem>>, vector<1x16x32xf32>
    %155 = vector.shape_cast %154 : vector<1x16x32xf32> to vector<16x32xf32>
    %156 = arith.mulf %145, %137 : vector<16x32xf32>
    %157 = arith.addf %155, %156 : vector<16x32xf32>
    %158 = math.tanh %157 : vector<16x32xf32>
    %cst_86 = arith.constant 1.000000e+00 : f32
    %159 = vector.broadcast %cst_86 : f32 to vector<16x32xf32>
    %160 = arith.subf %159, %153 : vector<16x32xf32>
    %161 = arith.mulf %160, %158 : vector<16x32xf32>
    %162 = arith.mulf %153, %132 : vector<16x32xf32>
    %163 = arith.addf %161, %162 : vector<16x32xf32>
    %c64 = arith.constant 64 : index
    %c0_87 = arith.constant 0 : index
    %164 = vector.load %arg11[%c64, %c0_87] : memref<128x32xf32, #tpu.memory_space<vmem>>, vector<16x32xf32>
    tpu.vector_store %arg11[%c64, %c0_87], %163 {strides = array<i32>} : memref<128x32xf32, #tpu.memory_space<vmem>>, vector<16x32xf32>,
    %cst_88 = arith.constant dense<0.000000e+00> : vector<16x32xf32>
    %165 = tpu.matmul %163, %1, %cst_88 {dimension_numbers = #tpu.dot_dimension_numbers<[1], [0], [0], [1], [0, 0, 1, 1], [], []>} : vector<16x32xf32>, vector<32x32xf32>, vector<16x32xf32> -> vector<16x32xf32>
    %cst_89 = arith.constant dense<0.000000e+00> : vector<16x32xf32>
    %166 = tpu.matmul %163, %3, %cst_89 {dimension_numbers = #tpu.dot_dimension_numbers<[1], [0], [0], [1], [0, 0, 1, 1], [], []>} : vector<16x32xf32>, vector<32x32xf32>, vector<16x32xf32> -> vector<16x32xf32>
    %cst_90 = arith.constant dense<0.000000e+00> : vector<16x32xf32>
    %167 = tpu.matmul %163, %5, %cst_90 {dimension_numbers = #tpu.dot_dimension_numbers<[1], [0], [0], [1], [0, 0, 1, 1], [], []>} : vector<16x32xf32>, vector<32x32xf32>, vector<16x32xf32> -> vector<16x32xf32>
    %168 = arith.addf %167, %8 : vector<16x32xf32>
    %c5 = arith.constant 5 : index
    %c0_91 = arith.constant 0 : index
    %c0_92 = arith.constant 0 : index
    %169 = vector.load %arg0[%c5, %c0_91, %c0_92] : memref<8x16x32xf32, #tpu.memory_space<vmem>>, vector<1x16x32xf32>
    %170 = vector.shape_cast %169 : vector<1x16x32xf32> to vector<16x32xf32>
    %171 = arith.addf %170, %165 : vector<16x32xf32>
    %172 = arith.negf %171 : vector<16x32xf32>
    %173 = math.exp %172 : vector<16x32xf32>
    %cst_93 = arith.constant 1.000000e+00 : f32
    %174 = vector.broadcast %cst_93 : f32 to vector<16x32xf32>
    %175 = arith.addf %174, %173 : vector<16x32xf32>
    %176 = arith.divf %174, %175 : vector<16x32xf32>
    %c5_94 = arith.constant 5 : index
    %c0_95 = arith.constant 0 : index
    %c0_96 = arith.constant 0 : index
    %177 = vector.load %arg1[%c5_94, %c0_95, %c0_96] : memref<8x16x32xf32, #tpu.memory_space<vmem>>, vector<1x16x32xf32>
    %178 = vector.shape_cast %177 : vector<1x16x32xf32> to vector<16x32xf32>
    %179 = arith.addf %178, %166 : vector<16x32xf32>
    %180 = arith.negf %179 : vector<16x32xf32>
    %181 = math.exp %180 : vector<16x32xf32>
    %cst_97 = arith.constant 1.000000e+00 : f32
    %182 = vector.broadcast %cst_97 : f32 to vector<16x32xf32>
    %183 = arith.addf %182, %181 : vector<16x32xf32>
    %184 = arith.divf %182, %183 : vector<16x32xf32>
    %c5_98 = arith.constant 5 : index
    %c0_99 = arith.constant 0 : index
    %c0_100 = arith.constant 0 : index
    %185 = vector.load %arg2[%c5_98, %c0_99, %c0_100] : memref<8x16x32xf32, #tpu.memory_space<vmem>>, vector<1x16x32xf32>
    %186 = vector.shape_cast %185 : vector<1x16x32xf32> to vector<16x32xf32>
    %187 = arith.mulf %176, %168 : vector<16x32xf32>
    %188 = arith.addf %186, %187 : vector<16x32xf32>
    %189 = math.tanh %188 : vector<16x32xf32>
    %cst_101 = arith.constant 1.000000e+00 : f32
    %190 = vector.broadcast %cst_101 : f32 to vector<16x32xf32>
    %191 = arith.subf %190, %184 : vector<16x32xf32>
    %192 = arith.mulf %191, %189 : vector<16x32xf32>
    %193 = arith.mulf %184, %163 : vector<16x32xf32>
    %194 = arith.addf %192, %193 : vector<16x32xf32>
    %c80 = arith.constant 80 : index
    %c0_102 = arith.constant 0 : index
    %195 = vector.load %arg11[%c80, %c0_102] : memref<128x32xf32, #tpu.memory_space<vmem>>, vector<16x32xf32>
    tpu.vector_store %arg11[%c80, %c0_102], %194 {strides = array<i32>} : memref<128x32xf32, #tpu.memory_space<vmem>>, vector<16x32xf32>,
    %cst_103 = arith.constant dense<0.000000e+00> : vector<16x32xf32>
    %196 = tpu.matmul %194, %1, %cst_103 {dimension_numbers = #tpu.dot_dimension_numbers<[1], [0], [0], [1], [0, 0, 1, 1], [], []>} : vector<16x32xf32>, vector<32x32xf32>, vector<16x32xf32> -> vector<16x32xf32>
    %cst_104 = arith.constant dense<0.000000e+00> : vector<16x32xf32>
    %197 = tpu.matmul %194, %3, %cst_104 {dimension_numbers = #tpu.dot_dimension_numbers<[1], [0], [0], [1], [0, 0, 1, 1], [], []>} : vector<16x32xf32>, vector<32x32xf32>, vector<16x32xf32> -> vector<16x32xf32>
    %cst_105 = arith.constant dense<0.000000e+00> : vector<16x32xf32>
    %198 = tpu.matmul %194, %5, %cst_105 {dimension_numbers = #tpu.dot_dimension_numbers<[1], [0], [0], [1], [0, 0, 1, 1], [], []>} : vector<16x32xf32>, vector<32x32xf32>, vector<16x32xf32> -> vector<16x32xf32>
    %199 = arith.addf %198, %8 : vector<16x32xf32>
    %c6 = arith.constant 6 : index
    %c0_106 = arith.constant 0 : index
    %c0_107 = arith.constant 0 : index
    %200 = vector.load %arg0[%c6, %c0_106, %c0_107] : memref<8x16x32xf32, #tpu.memory_space<vmem>>, vector<1x16x32xf32>
    %201 = vector.shape_cast %200 : vector<1x16x32xf32> to vector<16x32xf32>
    %202 = arith.addf %201, %196 : vector<16x32xf32>
    %203 = arith.negf %202 : vector<16x32xf32>
    %204 = math.exp %203 : vector<16x32xf32>
    %cst_108 = arith.constant 1.000000e+00 : f32
    %205 = vector.broadcast %cst_108 : f32 to vector<16x32xf32>
    %206 = arith.addf %205, %204 : vector<16x32xf32>
    %207 = arith.divf %205, %206 : vector<16x32xf32>
    %c6_109 = arith.constant 6 : index
    %c0_110 = arith.constant 0 : index
    %c0_111 = arith.constant 0 : index
    %208 = vector.load %arg1[%c6_109, %c0_110, %c0_111] : memref<8x16x32xf32, #tpu.memory_space<vmem>>, vector<1x16x32xf32>
    %209 = vector.shape_cast %208 : vector<1x16x32xf32> to vector<16x32xf32>
    %210 = arith.addf %209, %197 : vector<16x32xf32>
    %211 = arith.negf %210 : vector<16x32xf32>
    %212 = math.exp %211 : vector<16x32xf32>
    %cst_112 = arith.constant 1.000000e+00 : f32
    %213 = vector.broadcast %cst_112 : f32 to vector<16x32xf32>
    %214 = arith.addf %213, %212 : vector<16x32xf32>
    %215 = arith.divf %213, %214 : vector<16x32xf32>
    %c6_113 = arith.constant 6 : index
    %c0_114 = arith.constant 0 : index
    %c0_115 = arith.constant 0 : index
    %216 = vector.load %arg2[%c6_113, %c0_114, %c0_115] : memref<8x16x32xf32, #tpu.memory_space<vmem>>, vector<1x16x32xf32>
    %217 = vector.shape_cast %216 : vector<1x16x32xf32> to vector<16x32xf32>
    %218 = arith.mulf %207, %199 : vector<16x32xf32>
    %219 = arith.addf %217, %218 : vector<16x32xf32>
    %220 = math.tanh %219 : vector<16x32xf32>
    %cst_116 = arith.constant 1.000000e+00 : f32
    %221 = vector.broadcast %cst_116 : f32 to vector<16x32xf32>
    %222 = arith.subf %221, %215 : vector<16x32xf32>
    %223 = arith.mulf %222, %220 : vector<16x32xf32>
    %224 = arith.mulf %215, %194 : vector<16x32xf32>
    %225 = arith.addf %223, %224 : vector<16x32xf32>
    %c96 = arith.constant 96 : index
    %c0_117 = arith.constant 0 : index
    %226 = vector.load %arg11[%c96, %c0_117] : memref<128x32xf32, #tpu.memory_space<vmem>>, vector<16x32xf32>
    tpu.vector_store %arg11[%c96, %c0_117], %225 {strides = array<i32>} : memref<128x32xf32, #tpu.memory_space<vmem>>, vector<16x32xf32>,
    %cst_118 = arith.constant dense<0.000000e+00> : vector<16x32xf32>
    %227 = tpu.matmul %225, %1, %cst_118 {dimension_numbers = #tpu.dot_dimension_numbers<[1], [0], [0], [1], [0, 0, 1, 1], [], []>} : vector<16x32xf32>, vector<32x32xf32>, vector<16x32xf32> -> vector<16x32xf32>
    %cst_119 = arith.constant dense<0.000000e+00> : vector<16x32xf32>
    %228 = tpu.matmul %225, %3, %cst_119 {dimension_numbers = #tpu.dot_dimension_numbers<[1], [0], [0], [1], [0, 0, 1, 1], [], []>} : vector<16x32xf32>, vector<32x32xf32>, vector<16x32xf32> -> vector<16x32xf32>
    %cst_120 = arith.constant dense<0.000000e+00> : vector<16x32xf32>
    %229 = tpu.matmul %225, %5, %cst_120 {dimension_numbers = #tpu.dot_dimension_numbers<[1], [0], [0], [1], [0, 0, 1, 1], [], []>} : vector<16x32xf32>, vector<32x32xf32>, vector<16x32xf32> -> vector<16x32xf32>
    %230 = arith.addf %229, %8 : vector<16x32xf32>
    %c7 = arith.constant 7 : index
    %c0_121 = arith.constant 0 : index
    %c0_122 = arith.constant 0 : index
    %231 = vector.load %arg0[%c7, %c0_121, %c0_122] : memref<8x16x32xf32, #tpu.memory_space<vmem>>, vector<1x16x32xf32>
    %232 = vector.shape_cast %231 : vector<1x16x32xf32> to vector<16x32xf32>
    %233 = arith.addf %232, %227 : vector<16x32xf32>
    %234 = arith.negf %233 : vector<16x32xf32>
    %235 = math.exp %234 : vector<16x32xf32>
    %cst_123 = arith.constant 1.000000e+00 : f32
    %236 = vector.broadcast %cst_123 : f32 to vector<16x32xf32>
    %237 = arith.addf %236, %235 : vector<16x32xf32>
    %238 = arith.divf %236, %237 : vector<16x32xf32>
    %c7_124 = arith.constant 7 : index
    %c0_125 = arith.constant 0 : index
    %c0_126 = arith.constant 0 : index
    %239 = vector.load %arg1[%c7_124, %c0_125, %c0_126] : memref<8x16x32xf32, #tpu.memory_space<vmem>>, vector<1x16x32xf32>
    %240 = vector.shape_cast %239 : vector<1x16x32xf32> to vector<16x32xf32>
    %241 = arith.addf %240, %228 : vector<16x32xf32>
    %242 = arith.negf %241 : vector<16x32xf32>
    %243 = math.exp %242 : vector<16x32xf32>
    %cst_127 = arith.constant 1.000000e+00 : f32
    %244 = vector.broadcast %cst_127 : f32 to vector<16x32xf32>
    %245 = arith.addf %244, %243 : vector<16x32xf32>
    %246 = arith.divf %244, %245 : vector<16x32xf32>
    %c7_128 = arith.constant 7 : index
    %c0_129 = arith.constant 0 : index
    %c0_130 = arith.constant 0 : index
    %247 = vector.load %arg2[%c7_128, %c0_129, %c0_130] : memref<8x16x32xf32, #tpu.memory_space<vmem>>, vector<1x16x32xf32>
    %248 = vector.shape_cast %247 : vector<1x16x32xf32> to vector<16x32xf32>
    %249 = arith.mulf %238, %230 : vector<16x32xf32>
    %250 = arith.addf %248, %249 : vector<16x32xf32>
    %251 = math.tanh %250 : vector<16x32xf32>
    %cst_131 = arith.constant 1.000000e+00 : f32
    %252 = vector.broadcast %cst_131 : f32 to vector<16x32xf32>
    %253 = arith.subf %252, %246 : vector<16x32xf32>
    %254 = arith.mulf %253, %251 : vector<16x32xf32>
    %255 = arith.mulf %246, %225 : vector<16x32xf32>
    %256 = arith.addf %254, %255 : vector<16x32xf32>
    %c112 = arith.constant 112 : index
    %c0_132 = arith.constant 0 : index
    %257 = vector.load %arg11[%c112, %c0_132] : memref<128x32xf32, #tpu.memory_space<vmem>>, vector<16x32xf32>
    tpu.vector_store %arg11[%c112, %c0_132], %256 {strides = array<i32>} : memref<128x32xf32, #tpu.memory_space<vmem>>, vector<16x32xf32>,
    %c0_133 = arith.constant 0 : index
    %c0_134 = arith.constant 0 : index
    %258 = vector.load %arg11[%c0_133, %c0_134] : memref<128x32xf32, #tpu.memory_space<vmem>>, vector<128x32xf32>
    %c0_135 = arith.constant 0 : index
    %c0_136 = arith.constant 0 : index
    %259 = vector.load %arg6[%c0_135, %c0_136] : memref<32x16xf32, #tpu.memory_space<vmem>>, vector<32x16xf32>
    %cst_137 = arith.constant dense<0.000000e+00> : vector<128x16xf32>
    %260 = tpu.matmul %258, %259, %cst_137 {dimension_numbers = #tpu.dot_dimension_numbers<[1], [0], [0], [1], [0, 0, 1, 1], [], []>} : vector<128x32xf32>, vector<32x16xf32>, vector<128x16xf32> -> vector<128x16xf32>
    %c0_138 = arith.constant 0 : index
    %c0_139 = arith.constant 0 : index
    %261 = vector.load %arg7[%c0_138, %c0_139] : memref<1x16xf32, #tpu.memory_space<vmem>>, vector<1x16xf32>
    %262 = vector.shape_cast %261 : vector<1x16xf32> to vector<1x16xf32>
    %263 = vector.broadcast %262 : vector<1x16xf32> to vector<128x16xf32>
    %264 = arith.addf %260, %263 : vector<128x16xf32>
    %265 = math.tanh %264 : vector<128x16xf32>
    %c0_140 = arith.constant 0 : index
    %c0_141 = arith.constant 0 : index
    %266 = vector.load %arg8[%c0_140, %c0_141] : memref<16x128xf32, #tpu.memory_space<vmem>>, vector<16x128xf32>
    %cst_142 = arith.constant dense<0.000000e+00> : vector<128x128xf32>
    %267 = tpu.matmul %265, %266, %cst_142 {dimension_numbers = #tpu.dot_dimension_numbers<[1], [0], [0], [1], [0, 0, 1, 1], [], []>} : vector<128x16xf32>, vector<16x128xf32>, vector<128x128xf32> -> vector<128x128xf32>
    %c0_143 = arith.constant 0 : index
    %c0_144 = arith.constant 0 : index
    %268 = vector.load %arg9[%c0_143, %c0_144] : memref<1x128xf32, #tpu.memory_space<vmem>>, vector<1x128xf32>
    %269 = vector.shape_cast %268 : vector<1x128xf32> to vector<1x128xf32>
    %270 = vector.broadcast %269 : vector<1x128xf32> to vector<128x128xf32>
    %271 = arith.addf %267, %270 : vector<128x128xf32>
    %cst_145 = arith.constant dense<0xFF800000> : vector<128xf32>
    %272 = vector.multi_reduction <maximumf>, %271, %cst_145 [1] : vector<128x128xf32> to vector<128xf32>
    %273 = vector.shape_cast %272 : vector<128xf32> to vector<128x1xf32>
    %274 = vector.broadcast %273 : vector<128x1xf32> to vector<128x128xf32>
    %275 = arith.subf %271, %274 : vector<128x128xf32>
    %276 = math.exp %275 : vector<128x128xf32>
    %cst_146 = arith.constant dense<0.000000e+00> : vector<128xf32>
    %277 = vector.multi_reduction <add>, %276, %cst_146 [1] : vector<128x128xf32> to vector<128xf32>
    %278 = vector.shape_cast %277 : vector<128xf32> to vector<128x1xf32>
    %279 = math.log %278 : vector<128x1xf32>
    %280 = arith.addf %279, %273 : vector<128x1xf32>
    %281 = vector.broadcast %280 : vector<128x1xf32> to vector<128x128xf32>
    %282 = arith.subf %271, %281 : vector<128x128xf32>
    %c0_147 = arith.constant 0 : index
    %c0_148 = arith.constant 0 : index
    %283 = vector.load %arg10[%c0_147, %c0_148] : memref<128x128xf32, #tpu.memory_space<vmem>>, vector<128x128xf32>
    tpu.vector_store %arg10[%c0_147, %c0_148], %282 {strides = array<i32>} : memref<128x128xf32, #tpu.memory_space<vmem>>, vector<128x128xf32>,
    return
  }
}

</mosaic_0001>

<bundles_post_ra>
// kernel: tpu_custom_call.1
= control target key start
LH: loop header
LB: loop body
LE: loop exit
PB: predicated region body
PF: predicated region fallthrough
CT: control target
= control target key end

     0   :  { %15 = vsyncpa [#allocation4], 0  ;;  %s4789_s0 = inlined_call_operand.hbm [shape: f32[8,16,32], index: 0, kind: input, shape index: {}]   ;;  %s4790_s1 = inlined_call_operand.hbm [shape: f32[8,16,32], index: 1, kind: input, shape index: {}]   ;;  %s4791_s2 = inlined_call_operand.hbm [shape: f32[8,16,32], index: 2, kind: input, shape index: {}]   ;;  %s4792_s3 = inlined_call_operand.vmem [shape: f32[16,32], index: 3, kind: input, shape index: {}]   ;;  %s4793_s4 = inlined_call_operand.hbm [shape: f32[3,32,32], index: 4, kind: input, shape index: {}]   ;;  %s4794_s5 = inlined_call_operand.vmem [shape: f32[1,32], index: 5, kind: input, shape index: {}]   ;;  %s4795_s6 = inlined_call_operand.vmem [shape: f32[32,16], index: 6, kind: input, shape index: {}]   ;;  %s4796_s7 = inlined_call_operand.vmem [shape: f32[1,16], index: 7, kind: input, shape index: {}]   ;;  %s4797_s8 = inlined_call_operand.vmem [shape: f32[16,128], index: 8, kind: input, shape index: {}]   ;;  %s4798_s9 = inlined_call_operand.vmem [shape: f32[1,128], index: 9, kind: input, shape index: {}]   ;;  %s4799_s10 = inlined_call_operand.hbm [shape: f32[128,128], index: 10, kind: output, shape index: {}]  }
   0x1   :  { %16 = vsyncpa [#allocation7], 0 }
   0x2   :  { %17 = vsyncpa [#allocation10], 0 }
   0x3   :  { %18 = vsyncpa [#allocation5], 0  ;;  %s4039_s13 = smov [#allocation6]   ;;  %s4040_s15 = smov [#allocation3]  }
   0x4   :  { %s36_s14 = sshll.u32 %s4039_s13, 4  ;;  %s24_s16 = sshll.u32 %s4040_s15, 4  ;;  %s37_s14 = int_to_ptr.vmem [resolvable:$true] %s36_s14  ;;  %s25_s16 = int_to_ptr.vmem [resolvable:$true] %s24_s16 }
   0x5   :  { %s3939_s17 = scalar_lea.vmem %s37_s14, 2048  ;;  %p3944_p1 = scmp.lt.s32.totalorder %s37_s14, %s37_s14 }
   0x6   :  { %p3940_p0 = scmp.ne.s32.totalorder %s37_s14, %s3939_s17  ;;  %p3945_p2 = scmp.lt.s32.totalorder %s3939_s17, %s3939_s17 }
   0x8   :  { %p3946_p3 = por %p3945_p2, %p3944_p1 }
   0xa   :  { %p3947_p4 = pnand %p3946_p3, %p3940_p0 }
   0xc   :  { %3950 = shalt.err (!%p3947_p4)
}
   0xd   :  { %s4041_s18 = smov 128   ;;  %s4042_s19 = smov 8  }
   0xe   :  { %42 = dma.hbm_to_vmem [thread:$0]  %s4790_s1, 2048, %s37_s14, [#allocation7], %s4041_s18, %s4041_s18, %s4042_s19  }
   0xf   :  { %s3959_s22 = scalar_lea.vmem %s25_s16, 2048  ;;  %p3964_p6 = scmp.lt.s32.totalorder %s25_s16, %s25_s16 }
  0x10   :  { %p3960_p5 = scmp.ne.s32.totalorder %s25_s16, %s3959_s22  ;;  %p3965_p7 = scmp.lt.s32.totalorder %s3959_s22, %s3959_s22 }
  0x12   :  { %p3966_p8 = por %p3965_p7, %p3964_p6 }
  0x14   :  { %p3967_p9 = pnand %p3966_p8, %p3960_p5 }
  0x16   :  { %3970 = shalt.err (!%p3967_p9)
}
  0x17   :  { %30 = dma.hbm_to_vmem [thread:$0]  %s4789_s0, 2048, %s25_s16, [#allocation4], %s4041_s18, %s4041_s18, %s4042_s19  }
  0x18   :  { %s4043_s25 = smov [#allocation8]   ;;  %s4044_s27 = smov [#allocation9]  }
  0x19   :  { %s48_s26 = sshll.u32 %s4043_s25, 4  ;;  %s62_s28 = sshll.u32 %s4044_s27, 4  ;;  %s49_s26 = int_to_ptr.vmem [resolvable:$true] %s48_s26  ;;  %s63_s28 = int_to_ptr.vmem [resolvable:$true] %s62_s28 }
  0x1a   :  { %s3979_s1 = scalar_lea.vmem %s49_s26, 2048  ;;  %p3984_p11 = scmp.lt.s32.totalorder %s49_s26, %s49_s26 }
  0x1b   :  { %p3980_p10 = scmp.ne.s32.totalorder %s49_s26, %s3979_s1  ;;  %p3985_p12 = scmp.lt.s32.totalorder %s3979_s1, %s3979_s1 }
  0x1d   :  { %p3986_p13 = por %p3985_p12, %p3984_p11 }
  0x1f   :  { %p3987_p0 = pnand %p3986_p13, %p3980_p10 }
  0x21   :  { %3990 = shalt.err (!%p3987_p0)
}
  0x22   :  { %54 = dma.hbm_to_vmem [thread:$0]  %s4791_s2, 2048, %s49_s26, [#allocation7], %s4041_s18, %s4041_s18, %s4042_s19  }
  0x23   :  { %s3999_s0 = scalar_lea.vmem %s63_s28, 1536  ;;  %p4004_p2 = scmp.lt.s32.totalorder %s63_s28, %s63_s28 }
  0x24   :  { %p4000_p1 = scmp.ne.s32.totalorder %s63_s28, %s3999_s0  ;;  %p4005_p3 = scmp.lt.s32.totalorder %s3999_s0, %s3999_s0 }
  0x26   :  { %p4006_p4 = por %p4005_p3, %p4004_p2 }
  0x28   :  { %p4007_p5 = pnand %p4006_p4, %p4000_p1 }
  0x2a   :  { %4010 = shalt.err (!%p4007_p5)
}
  0x2b   :  { %68 = dma.hbm_to_vmem [thread:$0]  %s4793_s4, 1536, %s63_s28, [#allocation10], %s4041_s18, %s4041_s18, %s4042_s19  }
  0x2c   :  { %4031 = dma.done.wait [#allocation4], 2048  }
  0x2d   :  { %4032 = vsyncadd [#allocation4], 4294965248 }
  0x2e   :  { %4033 = dma.done.wait [#allocation7], 4096  }
  0x2f   :  { %4034 = vsyncadd [#allocation7], 4294963200 }
  0x30   :  { %4035 = dma.done.wait [#allocation10], 1536  }
  0x31   :  { %4036 = vsyncadd [#allocation10], 4294965760  ;;  %vm114_vm0 = vcmask 261120   ;;  %v4125_v0 = vld [vmem:[#allocation9 + $0x18] sm:$0xff]  ;;  %v4127_v1 = vld [vmem:[#allocation9 + $0x10] sm:$0xff]  ;;  %vm2629_vm1 = vcmask 130048  }
  0x32   :  { %3331 = vmatprep.subr.mxu0 %v4125_v0  ;;  %v4133_v2 = vld [vmem:[%s4792_s3] sm:$0xff]  ;;  %v4136_v3 = vld [vmem:[#allocation9 + $0x8] sm:$0xff]  ;;  %v4140_v4 = vld [vmem:[#allocation9 + $0x38] sm:$0xff] }
  0x33   :  { %3332 = vmatpush3.msra.mxu0 %v4125_v0  ;;  %3339 = vmatprep.mubr.msk.f32.mxu0 %vm114_vm0, %v4133_v2  ;;  %v4142_v5 = vld [vmem:[#allocation9 + $0x30] sm:$0xff]  ;;  %v4147_v6 = vld [vmem:[#allocation9] sm:$0xff]  ;;  %v4150_v7 = vld [vmem:[#allocation9 + $0x28] sm:$0xff] }
  0x34   :  { %3333 = vmatprep.subr.mxu0 %v4127_v1  ;;  %3342 = vmatprep.subr.mxu1 %v4140_v4  ;;  %v4158_v8 = vld [vmem:[%s4792_s3 + $0x8] sm:$0xff]  ;;  %v4161_v9 = vld [vmem:[#allocation9 + $0x20] sm:$0xff]  ;;  %v4167_v10 = vld [vmem:[#allocation9 + $0x58] sm:$0xff] }
  0x35   :  { %3334 = vmatpush3.msra.mxu0 %v4127_v1  ;;  %3343 = vmatpush3.msra.mxu1 %v4140_v4  ;;  %v4175_v11 = vld [vmem:[#allocation9 + $0x50] sm:$0xff]  ;;  %v4181_v12 = vld [vmem:[#allocation9 + $0x48] sm:$0xff]  ;;  %v4188_v13 = vld [vmem:[#allocation9 + $0x40] sm:$0xff] }
  0x36   :  { %3335 = vmatprep.subr.mxu0 %v4136_v3  ;;  %3344 = vmatprep.subr.mxu1 %v4142_v5  ;;  %v347_v14 = vld [vmem:[#allocation3 + $0x8] sm:$0xff]  ;;  %v346_v16 = vld [vmem:[#allocation3] sm:$0xff]  ;;  %v629_v63 = vld [vmem:[#allocation3 + $0x18] sm:$0xff] }
  0x37   :  { %3336 = vmatpush3.msra.mxu0 %v4136_v3  ;;  %3345 = vmatpush3.msra.mxu1 %v4142_v5  ;;  %v363_v20 = vld [vmem:[#allocation6 + $0x8] sm:$0xff]  ;;  %v362_v26 = vld [vmem:[#allocation6] sm:$0xff] }
  0x38   :  { %3337 = vmatprep.subr.mxu0 %v4147_v6  ;;  %3346 = vmatprep.subr.mxu1 %v4150_v7  ;;  %v4216_v36 = vld [vmem:[%s4794_s5] ss:$0 sm:$0xff]  ;;  %v379_v43 = vld [vmem:[#allocation8 + $0x8] sm:$0xff] }
  0x39   :  { %3338 = vmatpush3.msra.mxu0 %v4147_v6  ;;  %3347 = vmatpush3.msra.mxu1 %v4150_v7  ;;  %v378_v47 = vld [vmem:[#allocation8] sm:$0xff] }
  0x3a   :  { %3340 = vmatmul.mubr.msk.f32.vlgmr.msra.gmra.mxu0 %vm114_vm0, %v4158_v8  ;;  %3348 = vmatprep.subr.mxu1 %v4161_v9 }
  0x3b   :  { %3349 = vmatpush3.msra.mxu1 %v4161_v9  ;;  %3350 = vmatprep.mubr.msk.f32.mxu1 %vm114_vm0, %v4133_v2 }
  0x3c   :  { %3351 = vmatmul.mubr.msk.f32.vlgmr.msra.gmra.mxu1 %vm114_vm0, %v4158_v8  ;;  %3353 = vmatprep.subr.mxu0 %v4167_v10 }
  0x3d   :  { %3354 = vmatpush3.msra.mxu0 %v4167_v10  ;;  %3361 = vmatprep.mubr.msk.f32.mxu0 %vm114_vm0, %v4133_v2 }
  0x3e   :  { %3355 = vmatprep.subr.mxu0 %v4175_v11  ;;  %3364 = vmatprep.subr.mxu1 %v4125_v0 }
  0x3f   :  { %3356 = vmatpush3.msra.mxu0 %v4175_v11  ;;  %3365 = vmatpush3.msra.mxu1 %v4125_v0 }
  0x40   :  { %3357 = vmatprep.subr.mxu0 %v4181_v12  ;;  %3366 = vmatprep.subr.mxu1 %v4127_v1 }
  0x41   :  { %3358 = vmatpush3.msra.mxu0 %v4181_v12  ;;  %3367 = vmatpush3.msra.mxu1 %v4127_v1 }
  0x42   :  { %3359 = vmatprep.subr.mxu0 %v4188_v13  ;;  %3368 = vmatprep.subr.mxu1 %v4136_v3 }
  0x43   :  { %3360 = vmatpush3.msra.mxu0 %v4188_v13  ;;  %3369 = vmatpush3.msra.mxu1 %v4136_v3 }
  0x44   :  { %3362 = vmatmul.mubr.msk.f32.vlgmr.msra.gmra.mxu0 %vm114_vm0, %v4158_v8  ;;  %3375 = vmatprep.subr.mxu0 %v4140_v4 }
  0x45   :  { %3376 = vmatpush3.msra.mxu0 %v4140_v4  ;;  %3370 = vmatprep.subr.mxu1 %v4147_v6 }
  0x46   :  { %3377 = vmatprep.subr.mxu0 %v4142_v5  ;;  %3371 = vmatpush3.msra.mxu1 %v4147_v6 }
  0x47   :  { %3378 = vmatpush3.msra.mxu0 %v4142_v5  ;;  %3386 = vmatprep.subr.mxu1 %v4167_v10 }
  0x48   :  { %3379 = vmatprep.subr.mxu0 %v4150_v7 }
  0x49   :  { %3380 = vmatpush3.msra.mxu0 %v4150_v7 }
  0x4a   :  { %3381 = vmatprep.subr.mxu0 %v4161_v9 }
  0x4b   :  { %3382 = vmatpush3.msra.mxu0 %v4161_v9 }
  0x4c   :  { %3397 = vmatprep.subr.mxu0 %v4125_v0 }
  0xfa   :  { %v3341_v15 = vpop.f32.mrf.mxu0 }
  0xfb   :  { %v349_v17 = vadd.f32 %v3341_v15, %v347_v14 }
  0xfc   :  { %v187_v18 = vpop.f32.mrf.mxu0  ;;  %v3352_v19 = vpop.f32.mrf.mxu1 }
  0xfd   :  { %v3042_v21 = vmul.f32 -1.442695, %v349_v17  ;;  %v348_v22 = vadd.f32 %v346_v16, %v187_v18  ;;  %v365_v24 = vadd.f32 %v3352_v19, %v363_v20  ;;  %v646_v19 = vld [vmem:[#allocation6 + $0x18] sm:$0xff] }
  0xfe   :  { %v262_v25 = vpop.f32.mrf.mxu1 }
  0xff   :  { %3662 = vpow2.f32 %v3042_v21  ;;  %v3041_v23 = vmul.f32 -1.442695, %v348_v22  ;;  %v3044_v27 = vmul.f32 -1.442695, %v365_v24  ;;  %v364_v28 = vadd.f32 %v362_v26, %v262_v25  ;;  %v645_v22 = vld [vmem:[#allocation6 + $0x10] sm:$0xff] }
 0x101   :  { %3664 = vpow2.f32 %v3041_v23  ;;  %v3043_v29 = vmul.f32 -1.442695, %v364_v28 }
 0x102   :  { %3666 = vpow2.f32 %v3044_v27 }
 0x103   :  { %3668 = vpow2.f32 %v3043_v29 }
 0x104   :  { %v3363_v35 = vpop.f32.mrf.mxu0 }
 0x105   :  { %v343_v39 = vadd.f32 %v3363_v35, %v4216_v36 }
 0x106   :  { %v337_v40 = vpop.f32.mrf.mxu0 }
 0x107   :  { %v338_v45 = vadd.f32 %v4216_v36, %v337_v40  ;;  %v663_v40 = vld [vmem:[#allocation8 + $0x18] sm:$0xff] }
 0x10c   :  { %v3663_v30 = vpop.eup %3662 }
 0x10d   :  { %v357_v31 = vadd.f32 1.0, %v3663_v30 }
 0x10e   :  { %v3665_v32 = vpop.eup %3664 }
 0x10f   :  { %3670 = vrcp.f32 %v357_v31  ;;  %v356_v33 = vadd.f32 1.0, %v3665_v32  ;;  %v3667_v34 = vpop.eup %3666 }
 0x110   :  { %v373_v37 = vadd.f32 1.0, %v3667_v34  ;;  %v3669_v38 = vpop.eup %3668 }
 0x111   :  { %3672 = vrcp.f32 %v356_v33  ;;  %v372_v41 = vadd.f32 1.0, %v3669_v38 }
 0x112   :  { %3674 = vrcp.f32 %v373_v37 }
 0x113   :  { %3676 = vrcp.f32 %v372_v41 }
 0x11c   :  { %v3671_v42 = vpop.eup %3670 }
 0x11d   :  { %v381_v44 = vmul.f32 %v3671_v42, %v343_v39 }
 0x11e   :  { %v3673_v46 = vpop.eup %3672 }
 0x11f   :  { %v383_v48 = vadd.f32 %v381_v44, %v379_v43  ;;  %v380_v49 = vmul.f32 %v3673_v46, %v338_v45  ;;  %v3675_v51 = vpop.eup %3674  ;;  %v662_v44 = vld [vmem:[#allocation8 + $0x10] sm:$0xff] }
 0x120   :  { %v387_v52 = vsub.f32 1.0, %v3675_v51  ;;  %v3677_v53 = vpop.eup %3676  ;;  %v391_v57 = vmul.f32 %v3675_v51, %v4158_v8  ;;  %v628_v8 = vld [vmem:[#allocation3 + $0x10] sm:$0xff] }
 0x121   :  { %3678 = vtanh.f32 %v383_v48  ;;  %v382_v50 = vadd.f32 %v380_v49, %v378_v47  ;;  %v386_v55 = vsub.f32 1.0, %v3677_v53  ;;  %v390_v60 = vmul.f32 %v3677_v53, %v4133_v2 }
 0x123   :  { %3680 = vtanh.f32 %v382_v50 }
 0x12e   :  { %v3679_v54 = vpop.eup %3678 }
 0x12f   :  { %v389_v56 = vmul.f32 %v3679_v54, %v387_v52 }
 0x130   :  { %v3681_v58 = vpop.eup %3680 }
 0x131   :  { %v388_v59 = vmul.f32 %v3681_v58, %v386_v55  ;;  %v4222_v61 = vadd.f32 %v391_v57, %v389_v56 }
 0x133   :  { %v4224_v62 = vadd.f32 %v390_v60, %v388_v59  ;;  %395 = vst.msk [vmem:[#allocation2 + $0x8] sm:$0xff] %vm114_vm0, %v4222_v61  ;;  %v913_v60 = vld [vmem:[#allocation3 + $0x28] sm:$0xff] }
 0x135   :  { %394 = vst.msk [vmem:[#allocation2] sm:$0xff] %vm114_vm0, %v4224_v62  ;;  %3372 = vmatprep.mubr.msk.f32.mxu1 %vm114_vm0, %v4224_v62  ;;  %3383 = vmatprep.mubr.msk.f32.mxu0 %vm114_vm0, %v4224_v62 }
 0x136   :  { %3373 = vmatmul.mubr.msk.f32.vlgmr.msra.gmra.mxu1 %vm114_vm0, %v4222_v61  ;;  %3384 = vmatmul.mubr.msk.f32.vlgmr.msra.gmra.mxu0 %vm114_vm0, %v4222_v61 }
 0x137   :  { %3387 = vmatpush3.msra.mxu1 %v4167_v10  ;;  %3394 = vmatprep.mubr.msk.f32.mxu1 %vm114_vm0, %v4224_v62 }
 0x138   :  { %3388 = vmatprep.subr.mxu1 %v4175_v11  ;;  %3398 = vmatpush3.msra.mxu0 %v4125_v0 }
 0x139   :  { %3389 = vmatpush3.msra.mxu1 %v4175_v11  ;;  %3399 = vmatprep.subr.mxu0 %v4127_v1 }
 0x13a   :  { %3390 = vmatprep.subr.mxu1 %v4181_v12  ;;  %3400 = vmatpush3.msra.mxu0 %v4127_v1 }
 0x13b   :  { %3391 = vmatpush3.msra.mxu1 %v4181_v12  ;;  %3401 = vmatprep.subr.mxu0 %v4136_v3 }
 0x13c   :  { %3392 = vmatprep.subr.mxu1 %v4188_v13  ;;  %3402 = vmatpush3.msra.mxu0 %v4136_v3 }
 0x13d   :  { %3393 = vmatpush3.msra.mxu1 %v4188_v13  ;;  %3403 = vmatprep.subr.mxu0 %v4147_v6 }
 0x13e   :  { %3395 = vmatmul.mubr.msk.f32.vlgmr.msra.gmra.mxu1 %vm114_vm0, %v4222_v61  ;;  %3408 = vmatprep.subr.mxu1 %v4140_v4 }
 0x13f   :  { %3409 = vmatpush3.msra.mxu1 %v4140_v4  ;;  %3404 = vmatpush3.msra.mxu0 %v4147_v6 }
 0x140   :  { %3410 = vmatprep.subr.mxu1 %v4142_v5  ;;  %3419 = vmatprep.subr.mxu0 %v4167_v10 }
 0x141   :  { %3411 = vmatpush3.msra.mxu1 %v4142_v5 }
 0x142   :  { %3412 = vmatprep.subr.mxu1 %v4150_v7 }
 0x143   :  { %3413 = vmatpush3.msra.mxu1 %v4150_v7 }
 0x144   :  { %3414 = vmatprep.subr.mxu1 %v4161_v9 }
 0x145   :  { %3415 = vmatpush3.msra.mxu1 %v4161_v9 }
 0x146   :  { %3430 = vmatprep.subr.mxu1 %v4125_v0 }
 0x1f6   :  { %v3374_v2 = vpop.f32.mrf.mxu1  ;;  %v3385_v15 = vpop.f32.mrf.mxu0 }
 0x1f7   :  { %v631_v14 = vadd.f32 %v3374_v2, %v629_v63  ;;  %v648_v23 = vadd.f32 %v3385_v15, %v646_v19  ;;  %v929_v19 = vld [vmem:[#allocation6 + $0x20] sm:$0xff] }
 0x1f8   :  { %v468_v16 = vpop.f32.mrf.mxu1  ;;  %v543_v21 = vpop.f32.mrf.mxu0 }
 0x1f9   :  { %v3052_v17 = vmul.f32 -1.442695, %v631_v14  ;;  %v630_v18 = vadd.f32 %v628_v8, %v468_v16  ;;  %v647_v24 = vadd.f32 %v645_v22, %v543_v21  ;;  %v3054_v25 = vmul.f32 -1.442695, %v648_v23  ;;  %v930_v16 = vld [vmem:[#allocation6 + $0x28] sm:$0xff] }
 0x1fb   :  { %3682 = vpow2.f32 %v3052_v17  ;;  %v3051_v20 = vmul.f32 -1.442695, %v630_v18  ;;  %v3053_v26 = vmul.f32 -1.442695, %v647_v24 }
 0x1fd   :  { %3684 = vpow2.f32 %v3051_v20 }
 0x1fe   :  { %3686 = vpow2.f32 %v3054_v25  ;;  %v3396_v32 = vpop.f32.mrf.mxu1 }
 0x1ff   :  { %3688 = vpow2.f32 %v3053_v26  ;;  %v624_v38 = vadd.f32 %v3396_v32, %v4216_v36 }
 0x200   :  { %v618_v35 = vpop.f32.mrf.mxu1 }
 0x201   :  { %v619_v42 = vadd.f32 %v4216_v36, %v618_v35 }
 0x208   :  { %v3683_v27 = vpop.eup %3682 }
 0x209   :  { %v639_v28 = vadd.f32 1.0, %v3683_v27 }
 0x20a   :  { %v3685_v29 = vpop.eup %3684 }
 0x20b   :  { %3690 = vrcp.f32 %v639_v28  ;;  %v638_v30 = vadd.f32 1.0, %v3685_v29  ;;  %v3687_v31 = vpop.eup %3686 }
 0x20c   :  { %v3689_v33 = vpop.eup %3688  ;;  %v656_v34 = vadd.f32 1.0, %v3687_v31 }
 0x20d   :  { %3692 = vrcp.f32 %v638_v30  ;;  %v655_v37 = vadd.f32 1.0, %v3689_v33 }
 0x20e   :  { %3694 = vrcp.f32 %v656_v34 }
 0x20f   :  { %3696 = vrcp.f32 %v655_v37  ;;  %v947_v37 = vld [vmem:[#allocation8 + $0x28] sm:$0xff] }
 0x218   :  { %v3691_v39 = vpop.eup %3690 }
 0x219   :  { %v665_v41 = vmul.f32 %v3691_v39, %v624_v38 }
 0x21a   :  { %v3693_v43 = vpop.eup %3692 }
 0x21b   :  { %v667_v45 = vadd.f32 %v665_v41, %v663_v40  ;;  %v664_v46 = vmul.f32 %v3693_v43, %v619_v42  ;;  %v3695_v48 = vpop.eup %3694  ;;  %v946_v41 = vld [vmem:[#allocation8 + $0x20] sm:$0xff] }
 0x21c   :  { %v3697_v49 = vpop.eup %3696  ;;  %v671_v50 = vsub.f32 1.0, %v3695_v48  ;;  %v675_v54 = vmul.f32 %v3695_v48, %v4222_v61 }
 0x21d   :  { %3698 = vtanh.f32 %v667_v45  ;;  %v666_v47 = vadd.f32 %v664_v46, %v662_v44  ;;  %v670_v52 = vsub.f32 1.0, %v3697_v49  ;;  %v674_v57 = vmul.f32 %v3697_v49, %v4224_v62  ;;  %v912_v62 = vld [vmem:[#allocation3 + $0x20] sm:$0xff] }
 0x21f   :  { %3700 = vtanh.f32 %v666_v47 }
 0x22a   :  { %v3699_v51 = vpop.eup %3698 }
 0x22b   :  { %v673_v53 = vmul.f32 %v3699_v51, %v671_v50 }
 0x22c   :  { %v3701_v55 = vpop.eup %3700 }
 0x22d   :  { %v672_v56 = vmul.f32 %v3701_v55, %v670_v52  ;;  %v4270_v58 = vadd.f32 %v675_v54, %v673_v53 }
 0x22f   :  { %v4272_v59 = vadd.f32 %v674_v57, %v672_v56  ;;  %679 = vst.msk [vmem:[#allocation2 + $0x18] sm:$0xff] %vm114_vm0, %v4270_v58  ;;  %v1197_v57 = vld [vmem:[#allocation3 + $0x38] sm:$0xff] }
 0x231   :  { %678 = vst.msk [vmem:[#allocation2 + $0x10] sm:$0xff] %vm114_vm0, %v4272_v59  ;;  %3405 = vmatprep.mubr.msk.f32.mxu0 %vm114_vm0, %v4272_v59  ;;  %3416 = vmatprep.mubr.msk.f32.mxu1 %vm114_vm0, %v4272_v59 }
 0x232   :  { %3406 = vmatmul.mubr.msk.f32.vlgmr.msra.gmra.mxu0 %vm114_vm0, %v4270_v58  ;;  %3417 = vmatmul.mubr.msk.f32.vlgmr.msra.gmra.mxu1 %vm114_vm0, %v4270_v58 }
 0x233   :  { %3420 = vmatpush3.msra.mxu0 %v4167_v10  ;;  %3427 = vmatprep.mubr.msk.f32.mxu0 %vm114_vm0, %v4272_v59 }
 0x234   :  { %3421 = vmatprep.subr.mxu0 %v4175_v11  ;;  %3431 = vmatpush3.msra.mxu1 %v4125_v0 }
 0x235   :  { %3422 = vmatpush3.msra.mxu0 %v4175_v11  ;;  %3432 = vmatprep.subr.mxu1 %v4127_v1 }
 0x236   :  { %3423 = vmatprep.subr.mxu0 %v4181_v12  ;;  %3433 = vmatpush3.msra.mxu1 %v4127_v1 }
 0x237   :  { %3424 = vmatpush3.msra.mxu0 %v4181_v12  ;;  %3434 = vmatprep.subr.mxu1 %v4136_v3 }
 0x238   :  { %3425 = vmatprep.subr.mxu0 %v4188_v13  ;;  %3435 = vmatpush3.msra.mxu1 %v4136_v3 }
 0x239   :  { %3426 = vmatpush3.msra.mxu0 %v4188_v13  ;;  %3436 = vmatprep.subr.mxu1 %v4147_v6 }
 0x23a   :  { %3428 = vmatmul.mubr.msk.f32.vlgmr.msra.gmra.mxu0 %vm114_vm0, %v4270_v58  ;;  %3441 = vmatprep.subr.mxu0 %v4140_v4 }
 0x23b   :  { %3442 = vmatpush3.msra.mxu0 %v4140_v4  ;;  %3437 = vmatpush3.msra.mxu1 %v4147_v6 }
 0x23c   :  { %3443 = vmatprep.subr.mxu0 %v4142_v5  ;;  %3452 = vmatprep.subr.mxu1 %v4167_v10 }
 0x23d   :  { %3444 = vmatpush3.msra.mxu0 %v4142_v5 }
 0x23e   :  { %3445 = vmatprep.subr.mxu0 %v4150_v7 }
 0x23f   :  { %3446 = vmatpush3.msra.mxu0 %v4150_v7 }
 0x240   :  { %3447 = vmatprep.subr.mxu0 %v4161_v9 }
 0x241   :  { %3448 = vmatpush3.msra.mxu0 %v4161_v9 }
 0x242   :  { %3463 = vmatprep.subr.mxu0 %v4125_v0 }
 0x2f2   :  { %v3407_v61 = vpop.f32.mrf.mxu0  ;;  %v3418_v2 = vpop.f32.mrf.mxu1 }
 0x2f3   :  { %v915_v63 = vadd.f32 %v3407_v61, %v913_v60  ;;  %v932_v20 = vadd.f32 %v3418_v2, %v930_v16  ;;  %v1213_v16 = vld [vmem:[#allocation6 + $0x30] sm:$0xff] }
 0x2f4   :  { %v752_v8 = vpop.f32.mrf.mxu0  ;;  %v827_v18 = vpop.f32.mrf.mxu1 }
 0x2f5   :  { %v3062_v14 = vmul.f32 -1.442695, %v915_v63  ;;  %v914_v15 = vadd.f32 %v912_v62, %v752_v8  ;;  %v931_v21 = vadd.f32 %v929_v19, %v827_v18  ;;  %v3064_v22 = vmul.f32 -1.442695, %v932_v20  ;;  %v1214_v8 = vld [vmem:[#allocation6 + $0x38] sm:$0xff] }
 0x2f7   :  { %3702 = vpow2.f32 %v3062_v14  ;;  %v3061_v17 = vmul.f32 -1.442695, %v914_v15  ;;  %v3063_v23 = vmul.f32 -1.442695, %v931_v21 }
 0x2f9   :  { %3704 = vpow2.f32 %v3061_v17 }
 0x2fa   :  { %3706 = vpow2.f32 %v3064_v22  ;;  %v3429_v29 = vpop.f32.mrf.mxu0 }
 0x2fb   :  { %3708 = vpow2.f32 %v3063_v23  ;;  %v908_v34 = vadd.f32 %v3429_v29, %v4216_v36 }
 0x2fc   :  { %v902_v32 = vpop.f32.mrf.mxu0 }
 0x2fd   :  { %v903_v39 = vadd.f32 %v4216_v36, %v902_v32 }
 0x304   :  { %v3703_v24 = vpop.eup %3702 }
 0x305   :  { %v923_v25 = vadd.f32 1.0, %v3703_v24 }
 0x306   :  { %v3705_v26 = vpop.eup %3704 }
 0x307   :  { %3710 = vrcp.f32 %v923_v25  ;;  %v922_v27 = vadd.f32 1.0, %v3705_v26  ;;  %v3707_v28 = vpop.eup %3706 }
 0x308   :  { %v3709_v30 = vpop.eup %3708  ;;  %v940_v31 = vadd.f32 1.0, %v3707_v28 }
 0x309   :  { %3712 = vrcp.f32 %v922_v27  ;;  %v939_v33 = vadd.f32 1.0, %v3709_v30 }
 0x30a   :  { %3714 = vrcp.f32 %v940_v31 }
 0x30b   :  { %3716 = vrcp.f32 %v939_v33  ;;  %v1231_v33 = vld [vmem:[#allocation8 + $0x38] sm:$0xff] }
 0x314   :  { %v3711_v35 = vpop.eup %3710 }
 0x315   :  { %v949_v38 = vmul.f32 %v3711_v35, %v908_v34 }
 0x316   :  { %v3713_v40 = vpop.eup %3712 }
 0x317   :  { %v951_v42 = vadd.f32 %v949_v38, %v947_v37  ;;  %v948_v43 = vmul.f32 %v3713_v40, %v903_v39  ;;  %v3715_v45 = vpop.eup %3714  ;;  %v1230_v38 = vld [vmem:[#allocation8 + $0x30] sm:$0xff] }
 0x318   :  { %v3717_v46 = vpop.eup %3716  ;;  %v955_v47 = vsub.f32 1.0, %v3715_v45  ;;  %v959_v51 = vmul.f32 %v3715_v45, %v4270_v58 }
 0x319   :  { %3718 = vtanh.f32 %v951_v42  ;;  %v950_v44 = vadd.f32 %v948_v43, %v946_v41  ;;  %v954_v49 = vsub.f32 1.0, %v3717_v46  ;;  %v958_v54 = vmul.f32 %v3717_v46, %v4272_v59  ;;  %v1196_v59 = vld [vmem:[#allocation3 + $0x30] sm:$0xff] }
 0x31b   :  { %3720 = vtanh.f32 %v950_v44 }
 0x326   :  { %v3719_v48 = vpop.eup %3718 }
 0x327   :  { %v957_v50 = vmul.f32 %v3719_v48, %v955_v47 }
 0x328   :  { %v3721_v52 = vpop.eup %3720 }
 0x329   :  { %v956_v53 = vmul.f32 %v3721_v52, %v954_v49  ;;  %v4318_v55 = vadd.f32 %v959_v51, %v957_v50 }
 0x32b   :  { %v4320_v56 = vadd.f32 %v958_v54, %v956_v53  ;;  %963 = vst.msk [vmem:[#allocation2 + $0x28] sm:$0xff] %vm114_vm0, %v4318_v55  ;;  %v1481_v54 = vld [vmem:[#allocation3 + $0x48] sm:$0xff] }
 0x32d   :  { %962 = vst.msk [vmem:[#allocation2 + $0x20] sm:$0xff] %vm114_vm0, %v4320_v56  ;;  %3438 = vmatprep.mubr.msk.f32.mxu1 %vm114_vm0, %v4320_v56  ;;  %3449 = vmatprep.mubr.msk.f32.mxu0 %vm114_vm0, %v4320_v56 }
 0x32e   :  { %3439 = vmatmul.mubr.msk.f32.vlgmr.msra.gmra.mxu1 %vm114_vm0, %v4318_v55  ;;  %3450 = vmatmul.mubr.msk.f32.vlgmr.msra.gmra.mxu0 %vm114_vm0, %v4318_v55 }
 0x32f   :  { %3453 = vmatpush3.msra.mxu1 %v4167_v10  ;;  %3460 = vmatprep.mubr.msk.f32.mxu1 %vm114_vm0, %v4320_v56 }
 0x330   :  { %3454 = vmatprep.subr.mxu1 %v4175_v11  ;;  %3464 = vmatpush3.msra.mxu0 %v4125_v0 }
 0x331   :  { %3455 = vmatpush3.msra.mxu1 %v4175_v11  ;;  %3465 = vmatprep.subr.mxu0 %v4127_v1 }
 0x332   :  { %3456 = vmatprep.subr.mxu1 %v4181_v12  ;;  %3466 = vmatpush3.msra.mxu0 %v4127_v1 }
 0x333   :  { %3457 = vmatpush3.msra.mxu1 %v4181_v12  ;;  %3467 = vmatprep.subr.mxu0 %v4136_v3 }
 0x334   :  { %3458 = vmatprep.subr.mxu1 %v4188_v13  ;;  %3468 = vmatpush3.msra.mxu0 %v4136_v3 }
 0x335   :  { %3459 = vmatpush3.msra.mxu1 %v4188_v13  ;;  %3469 = vmatprep.subr.mxu0 %v4147_v6 }
 0x336   :  { %3461 = vmatmul.mubr.msk.f32.vlgmr.msra.gmra.mxu1 %vm114_vm0, %v4318_v55  ;;  %3474 = vmatprep.subr.mxu1 %v4140_v4 }
 0x337   :  { %3475 = vmatpush3.msra.mxu1 %v4140_v4  ;;  %3470 = vmatpush3.msra.mxu0 %v4147_v6 }
 0x338   :  { %3476 = vmatprep.subr.mxu1 %v4142_v5  ;;  %3485 = vmatprep.subr.mxu0 %v4167_v10 }
 0x339   :  { %3477 = vmatpush3.msra.mxu1 %v4142_v5 }
 0x33a   :  { %3478 = vmatprep.subr.mxu1 %v4150_v7 }
 0x33b   :  { %3479 = vmatpush3.msra.mxu1 %v4150_v7 }
 0x33c   :  { %3480 = vmatprep.subr.mxu1 %v4161_v9 }
 0x33d   :  { %3481 = vmatpush3.msra.mxu1 %v4161_v9 }
 0x33e   :  { %3496 = vmatprep.subr.mxu1 %v4125_v0 }
 0x3ee   :  { %v3440_v58 = vpop.f32.mrf.mxu1  ;;  %v3451_v61 = vpop.f32.mrf.mxu0 }
 0x3ef   :  { %v1199_v60 = vadd.f32 %v3440_v58, %v1197_v57  ;;  %v1216_v17 = vadd.f32 %v3451_v61, %v1214_v8  ;;  %v1497_v8 = vld [vmem:[#allocation6 + $0x40] sm:$0xff] }
 0x3f0   :  { %v1036_v62 = vpop.f32.mrf.mxu1  ;;  %v1111_v15 = vpop.f32.mrf.mxu0 }
 0x3f1   :  { %v3072_v63 = vmul.f32 -1.442695, %v1199_v60  ;;  %v1198_v2 = vadd.f32 %v1196_v59, %v1036_v62  ;;  %v1215_v18 = vadd.f32 %v1213_v16, %v1111_v15  ;;  %v3074_v19 = vmul.f32 -1.442695, %v1216_v17  ;;  %v1498_v62 = vld [vmem:[#allocation6 + $0x48] sm:$0xff] }
 0x3f3   :  { %3722 = vpow2.f32 %v3072_v63  ;;  %v3071_v14 = vmul.f32 -1.442695, %v1198_v2  ;;  %v3073_v20 = vmul.f32 -1.442695, %v1215_v18 }
 0x3f5   :  { %3724 = vpow2.f32 %v3071_v14 }
 0x3f6   :  { %3726 = vpow2.f32 %v3074_v19  ;;  %v3462_v26 = vpop.f32.mrf.mxu1 }
 0x3f7   :  { %3728 = vpow2.f32 %v3073_v20  ;;  %v1192_v31 = vadd.f32 %v3462_v26, %v4216_v36 }
 0x3f8   :  { %v1186_v29 = vpop.f32.mrf.mxu1 }
 0x3f9   :  { %v1187_v35 = vadd.f32 %v4216_v36, %v1186_v29 }
 0x400   :  { %v3723_v21 = vpop.eup %3722 }
 0x401   :  { %v1207_v22 = vadd.f32 1.0, %v3723_v21 }
 0x402   :  { %v3725_v23 = vpop.eup %3724 }
 0x403   :  { %3730 = vrcp.f32 %v1207_v22  ;;  %v1206_v24 = vadd.f32 1.0, %v3725_v23  ;;  %v3727_v25 = vpop.eup %3726 }
 0x404   :  { %v3729_v27 = vpop.eup %3728  ;;  %v1224_v28 = vadd.f32 1.0, %v3727_v25 }
 0x405   :  { %3732 = vrcp.f32 %v1206_v24  ;;  %v1223_v30 = vadd.f32 1.0, %v3729_v27 }
 0x406   :  { %3734 = vrcp.f32 %v1224_v28 }
 0x407   :  { %3736 = vrcp.f32 %v1223_v30  ;;  %v1515_v30 = vld [vmem:[#allocation8 + $0x48] sm:$0xff] }
 0x410   :  { %v3731_v32 = vpop.eup %3730 }
 0x411   :  { %v1233_v34 = vmul.f32 %v3731_v32, %v1192_v31 }
 0x412   :  { %v3733_v37 = vpop.eup %3732 }
 0x413   :  { %v1235_v39 = vadd.f32 %v1233_v34, %v1231_v33  ;;  %v1232_v40 = vmul.f32 %v3733_v37, %v1187_v35  ;;  %v3735_v42 = vpop.eup %3734  ;;  %v1514_v34 = vld [vmem:[#allocation8 + $0x40] sm:$0xff] }
 0x414   :  { %v3737_v43 = vpop.eup %3736  ;;  %v1239_v44 = vsub.f32 1.0, %v3735_v42  ;;  %v1243_v48 = vmul.f32 %v3735_v42, %v4318_v55 }
 0x415   :  { %3738 = vtanh.f32 %v1235_v39  ;;  %v1234_v41 = vadd.f32 %v1232_v40, %v1230_v38  ;;  %v1238_v46 = vsub.f32 1.0, %v3737_v43  ;;  %v1242_v51 = vmul.f32 %v3737_v43, %v4320_v56  ;;  %v1480_v56 = vld [vmem:[#allocation3 + $0x40] sm:$0xff] }
 0x417   :  { %3740 = vtanh.f32 %v1234_v41 }
 0x422   :  { %v3739_v45 = vpop.eup %3738 }
 0x423   :  { %v1241_v47 = vmul.f32 %v3739_v45, %v1239_v44 }
 0x424   :  { %v3741_v49 = vpop.eup %3740 }
 0x425   :  { %v1240_v50 = vmul.f32 %v3741_v49, %v1238_v46  ;;  %v4366_v52 = vadd.f32 %v1243_v48, %v1241_v47 }
 0x427   :  { %v4368_v53 = vadd.f32 %v1242_v51, %v1240_v50  ;;  %1247 = vst.msk [vmem:[#allocation2 + $0x38] sm:$0xff] %vm114_vm0, %v4366_v52 }
 0x429   :  { %1246 = vst.msk [vmem:[#allocation2 + $0x30] sm:$0xff] %vm114_vm0, %v4368_v53  ;;  %3471 = vmatprep.mubr.msk.f32.mxu0 %vm114_vm0, %v4368_v53  ;;  %3482 = vmatprep.mubr.msk.f32.mxu1 %vm114_vm0, %v4368_v53 }
 0x42a   :  { %3472 = vmatmul.mubr.msk.f32.vlgmr.msra.gmra.mxu0 %vm114_vm0, %v4366_v52  ;;  %3483 = vmatmul.mubr.msk.f32.vlgmr.msra.gmra.mxu1 %vm114_vm0, %v4366_v52 }
 0x42b   :  { %3486 = vmatpush3.msra.mxu0 %v4167_v10  ;;  %3493 = vmatprep.mubr.msk.f32.mxu0 %vm114_vm0, %v4368_v53 }
 0x42c   :  { %3487 = vmatprep.subr.mxu0 %v4175_v11  ;;  %3497 = vmatpush3.msra.mxu1 %v4125_v0 }
 0x42d   :  { %3488 = vmatpush3.msra.mxu0 %v4175_v11  ;;  %3498 = vmatprep.subr.mxu1 %v4127_v1 }
 0x42e   :  { %3489 = vmatprep.subr.mxu0 %v4181_v12  ;;  %3499 = vmatpush3.msra.mxu1 %v4127_v1 }
 0x42f   :  { %3490 = vmatpush3.msra.mxu0 %v4181_v12  ;;  %3500 = vmatprep.subr.mxu1 %v4136_v3 }
 0x430   :  { %3491 = vmatprep.subr.mxu0 %v4188_v13  ;;  %3501 = vmatpush3.msra.mxu1 %v4136_v3 }
 0x431   :  { %3492 = vmatpush3.msra.mxu0 %v4188_v13  ;;  %3502 = vmatprep.subr.mxu1 %v4147_v6 }
 0x432   :  { %3494 = vmatmul.mubr.msk.f32.vlgmr.msra.gmra.mxu0 %vm114_vm0, %v4366_v52  ;;  %3507 = vmatprep.subr.mxu0 %v4140_v4 }
 0x433   :  { %3508 = vmatpush3.msra.mxu0 %v4140_v4  ;;  %3503 = vmatpush3.msra.mxu1 %v4147_v6 }
 0x434   :  { %3509 = vmatprep.subr.mxu0 %v4142_v5  ;;  %3518 = vmatprep.subr.mxu1 %v4167_v10 }
 0x435   :  { %3510 = vmatpush3.msra.mxu0 %v4142_v5 }
 0x436   :  { %3511 = vmatprep.subr.mxu0 %v4150_v7 }
 0x437   :  { %3512 = vmatpush3.msra.mxu0 %v4150_v7 }
 0x438   :  { %3513 = vmatprep.subr.mxu0 %v4161_v9 }
 0x439   :  { %3514 = vmatpush3.msra.mxu0 %v4161_v9 }
 0x43a   :  { %3529 = vmatprep.subr.mxu0 %v4125_v0 }
 0x4ea   :  { %v3473_v55 = vpop.f32.mrf.mxu0  ;;  %v3484_v58 = vpop.f32.mrf.mxu1 }
 0x4eb   :  { %v1483_v57 = vadd.f32 %v3473_v55, %v1481_v54  ;;  %v1500_v14 = vadd.f32 %v3484_v58, %v1498_v62 }
 0x4ec   :  { %v1320_v59 = vpop.f32.mrf.mxu0  ;;  %v1395_v2 = vpop.f32.mrf.mxu1 }
 0x4ed   :  { %v3082_v60 = vmul.f32 -1.442695, %v1483_v57  ;;  %v1482_v61 = vadd.f32 %v1480_v56, %v1320_v59  ;;  %v1499_v15 = vadd.f32 %v1497_v8, %v1395_v2  ;;  %v3084_v16 = vmul.f32 -1.442695, %v1500_v14 }
 0x4ef   :  { %3742 = vpow2.f32 %v3082_v60  ;;  %v3081_v63 = vmul.f32 -1.442695, %v1482_v61  ;;  %v3083_v17 = vmul.f32 -1.442695, %v1499_v15 }
 0x4f1   :  { %3744 = vpow2.f32 %v3081_v63 }
 0x4f2   :  { %3746 = vpow2.f32 %v3084_v16  ;;  %v3495_v23 = vpop.f32.mrf.mxu0  ;;  %v1799_v16 = vld [vmem:[#allocation8 + $0x58] sm:$0xff] }
 0x4f3   :  { %3748 = vpow2.f32 %v3083_v17  ;;  %v1476_v28 = vadd.f32 %v3495_v23, %v4216_v36 }
 0x4f4   :  { %v1470_v26 = vpop.f32.mrf.mxu0 }
 0x4f5   :  { %v1471_v32 = vadd.f32 %v4216_v36, %v1470_v26 }
 0x4fc   :  { %v3743_v18 = vpop.eup %3742 }
 0x4fd   :  { %v1491_v19 = vadd.f32 1.0, %v3743_v18 }
 0x4fe   :  { %v3745_v20 = vpop.eup %3744 }
 0x4ff   :  { %3750 = vrcp.f32 %v1491_v19  ;;  %v1490_v21 = vadd.f32 1.0, %v3745_v20  ;;  %v3747_v22 = vpop.eup %3746  ;;  %v1798_v20 = vld [vmem:[#allocation8 + $0x50] sm:$0xff] }
 0x500   :  { %v3749_v24 = vpop.eup %3748  ;;  %v1508_v25 = vadd.f32 1.0, %v3747_v22 }
 0x501   :  { %3752 = vrcp.f32 %v1490_v21  ;;  %v1507_v27 = vadd.f32 1.0, %v3749_v24 }
 0x502   :  { %3754 = vrcp.f32 %v1508_v25 }
 0x503   :  { %3756 = vrcp.f32 %v1507_v27 }
 0x50c   :  { %v3751_v29 = vpop.eup %3750 }
 0x50d   :  { %v1517_v31 = vmul.f32 %v3751_v29, %v1476_v28 }
 0x50e   :  { %v3753_v33 = vpop.eup %3752 }
 0x50f   :  { %v1519_v35 = vadd.f32 %v1517_v31, %v1515_v30  ;;  %v1516_v37 = vmul.f32 %v3753_v33, %v1471_v32  ;;  %v3755_v39 = vpop.eup %3754 }
 0x510   :  { %v3757_v40 = vpop.eup %3756  ;;  %v1523_v41 = vsub.f32 1.0, %v3755_v39  ;;  %v1527_v45 = vmul.f32 %v3755_v39, %v4366_v52  ;;  %v1781_v52 = vld [vmem:[#allocation6 + $0x50] sm:$0xff]  ;;  %v4490_v39 = vld [vmem:[#allocation9 + $0x48] sm:$0xff] }
 0x511   :  { %3758 = vtanh.f32 %v1519_v35  ;;  %v1518_v38 = vadd.f32 %v1516_v37, %v1514_v34  ;;  %v1522_v43 = vsub.f32 1.0, %v3757_v40  ;;  %v1526_v48 = vmul.f32 %v3757_v40, %v4368_v53  ;;  %v4480_v35 = vld [vmem:[#allocation9 + $0x58] sm:$0xff]  ;;  %v4485_v37 = vld [vmem:[#allocation9 + $0x50] sm:$0xff]  ;;  %v3923_v40 = vld [vmem:[#allocation9 + $0x8] sm:$0xff] }
 0x513   :  { %3760 = vtanh.f32 %v1518_v38  ;;  %v3921_v38 = vld [vmem:[#allocation9 + $0x10] sm:$0xff] }
 0x51e   :  { %v3759_v42 = vpop.eup %3758 }
 0x51f   :  { %v1525_v44 = vmul.f32 %v3759_v42, %v1523_v41  ;;  %v4494_v41 = vld [vmem:[#allocation9 + $0x40] sm:$0xff] }
 0x520   :  { %v3761_v46 = vpop.eup %3760  ;;  %v3925_v42 = vld [vmem:[#allocation9] sm:$0xff] }
 0x521   :  { %v1524_v47 = vmul.f32 %v3761_v46, %v1522_v43  ;;  %v4414_v49 = vadd.f32 %v1527_v45, %v1525_v44  ;;  %v3926_v43 = vld [vmem:[#allocation9 + $0x38] sm:$0xff]  ;;  %v3927_v44 = vld [vmem:[#allocation9 + $0x30] sm:$0xff]  ;;  %v3928_v45 = vld [vmem:[#allocation9 + $0x28] sm:$0xff] }
 0x522   :  { %v3929_v46 = vld [vmem:[#allocation9 + $0x20] sm:$0xff] }
 0x523   :  { %v4416_v50 = vadd.f32 %v1526_v48, %v1524_v47  ;;  %1531 = vst.msk [vmem:[#allocation2 + $0x48] sm:$0xff] %vm114_vm0, %v4414_v49  ;;  %v4504_v47 = vld [vmem:[%s4795_s6 + $0x18] sm:$0xff]  ;;  %v2049_v48 = vld [vmem:[#allocation3 + $0x68] sm:$0xff] }
 0x525   :  { %1530 = vst.msk [vmem:[#allocation2 + $0x40] sm:$0xff] %vm114_vm0, %v4416_v50  ;;  %3504 = vmatprep.mubr.msk.f32.mxu1 %vm114_vm0, %v4416_v50  ;;  %3515 = vmatprep.mubr.msk.f32.mxu0 %vm114_vm0, %v4416_v50 }
 0x526   :  { %3505 = vmatmul.mubr.msk.f32.vlgmr.msra.gmra.mxu1 %vm114_vm0, %v4414_v49  ;;  %3516 = vmatmul.mubr.msk.f32.vlgmr.msra.gmra.mxu0 %vm114_vm0, %v4414_v49 }
 0x527   :  { %3519 = vmatpush3.msra.mxu1 %v4167_v10  ;;  %3526 = vmatprep.mubr.msk.f32.mxu1 %vm114_vm0, %v4416_v50 }
 0x528   :  { %3520 = vmatprep.subr.mxu1 %v4175_v11  ;;  %3530 = vmatpush3.msra.mxu0 %v4125_v0  ;;  %v4457_v0 = vld [vmem:[#allocation9 + $0x18] sm:$0xff] }
 0x529   :  { %3521 = vmatpush3.msra.mxu1 %v4175_v11  ;;  %3531 = vmatprep.subr.mxu0 %v4127_v1 }
 0x52a   :  { %3522 = vmatprep.subr.mxu1 %v4181_v12  ;;  %3532 = vmatpush3.msra.mxu0 %v4127_v1  ;;  %v1765_v1 = vld [vmem:[#allocation3 + $0x58] sm:$0xff] }
 0x52b   :  { %3523 = vmatpush3.msra.mxu1 %v4181_v12  ;;  %3533 = vmatprep.subr.mxu0 %v4136_v3 }
 0x52c   :  { %3524 = vmatprep.subr.mxu1 %v4188_v13  ;;  %3534 = vmatpush3.msra.mxu0 %v4136_v3 }
 0x52d   :  { %3525 = vmatpush3.msra.mxu1 %v4188_v13  ;;  %3535 = vmatprep.subr.mxu0 %v4147_v6  ;;  %v1782_v13 = vld [vmem:[#allocation6 + $0x58] sm:$0xff] }
 0x52e   :  { %3527 = vmatmul.mubr.msk.f32.vlgmr.msra.gmra.mxu1 %vm114_vm0, %v4414_v49  ;;  %3540 = vmatprep.subr.mxu1 %v4140_v4 }
 0x52f   :  { %3541 = vmatpush3.msra.mxu1 %v4140_v4  ;;  %3536 = vmatpush3.msra.mxu0 %v4147_v6  ;;  %v1764_v4 = vld [vmem:[#allocation3 + $0x50] sm:$0xff] }
 0x530   :  { %3542 = vmatprep.subr.mxu1 %v4142_v5  ;;  %3551 = vmatprep.subr.mxu0 %v4167_v10 }
 0x531   :  { %3543 = vmatpush3.msra.mxu1 %v4142_v5 }
 0x532   :  { %3544 = vmatprep.subr.mxu1 %v4150_v7 }
 0x533   :  { %3545 = vmatpush3.msra.mxu1 %v4150_v7 }
 0x534   :  { %3546 = vmatprep.subr.mxu1 %v4161_v9 }
 0x535   :  { %3547 = vmatpush3.msra.mxu1 %v4161_v9 }
 0x536   :  { %3562 = vmatprep.subr.mxu1 %v4457_v0 }
 0x5e6   :  { %v3506_v3 = vpop.f32.mrf.mxu1  ;;  %v3517_v11 = vpop.f32.mrf.mxu0 }
 0x5e7   :  { %v1767_v6 = vadd.f32 %v3506_v3, %v1765_v1  ;;  %v1784_v53 = vadd.f32 %v3517_v11, %v1782_v13  ;;  %v2066_v11 = vld [vmem:[#allocation6 + $0x68] sm:$0xff] }
 0x5e8   :  { %v1604_v10 = vpop.f32.mrf.mxu1  ;;  %v1679_v7 = vpop.f32.mrf.mxu0 }
 0x5e9   :  { %v3092_v12 = vmul.f32 -1.442695, %v1767_v6  ;;  %v1766_v5 = vadd.f32 %v1764_v4, %v1604_v10  ;;  %v1783_v9 = vadd.f32 %v1781_v52, %v1679_v7  ;;  %v3094_v54 = vmul.f32 -1.442695, %v1784_v53 }
 0x5eb   :  { %3762 = vpow2.f32 %v3092_v12  ;;  %v3091_v51 = vmul.f32 -1.442695, %v1766_v5  ;;  %v3093_v55 = vmul.f32 -1.442695, %v1783_v9  ;;  %v2065_v5 = vld [vmem:[#allocation6 + $0x60] sm:$0xff] }
 0x5ed   :  { %3764 = vpow2.f32 %v3091_v51 }
 0x5ee   :  { %3766 = vpow2.f32 %v3094_v54  ;;  %v3528_v61 = vpop.f32.mrf.mxu1 }
 0x5ef   :  { %3768 = vpow2.f32 %v3093_v55  ;;  %v1760_v14 = vadd.f32 %v3528_v61, %v4216_v36 }
 0x5f0   :  { %v1754_v2 = vpop.f32.mrf.mxu1 }
 0x5f1   :  { %v1755_v18 = vadd.f32 %v4216_v36, %v1754_v2 }
 0x5f8   :  { %v3763_v56 = vpop.eup %3762 }
 0x5f9   :  { %v1775_v57 = vadd.f32 1.0, %v3763_v56 }
 0x5fa   :  { %v3765_v58 = vpop.eup %3764 }
 0x5fb   :  { %3770 = vrcp.f32 %v1775_v57  ;;  %v1774_v59 = vadd.f32 1.0, %v3765_v58  ;;  %v3767_v60 = vpop.eup %3766 }
 0x5fc   :  { %v3769_v62 = vpop.eup %3768  ;;  %v1792_v63 = vadd.f32 1.0, %v3767_v60 }
 0x5fd   :  { %3772 = vrcp.f32 %v1774_v59  ;;  %v1791_v8 = vadd.f32 1.0, %v3769_v62  ;;  %v4510_v62 = vld [vmem:[%s4794_s5] ss:$0 sm:$0xff] }
 0x5fe   :  { %3774 = vrcp.f32 %v1792_v63 }
 0x5ff   :  { %3776 = vrcp.f32 %v1791_v8  ;;  %v2083_v8 = vld [vmem:[#allocation8 + $0x68] sm:$0xff] }
 0x608   :  { %v3771_v15 = vpop.eup %3770 }
 0x609   :  { %v1801_v17 = vmul.f32 %v3771_v15, %v1760_v14 }
 0x60a   :  { %v3773_v19 = vpop.eup %3772 }
 0x60b   :  { %v1803_v21 = vadd.f32 %v1801_v17, %v1799_v16  ;;  %v1800_v22 = vmul.f32 %v3773_v19, %v1755_v18  ;;  %v3775_v24 = vpop.eup %3774  ;;  %v2082_v17 = vld [vmem:[#allocation8 + $0x60] sm:$0xff] }
 0x60c   :  { %v3777_v25 = vpop.eup %3776  ;;  %v1807_v26 = vsub.f32 1.0, %v3775_v24  ;;  %v1811_v30 = vmul.f32 %v3775_v24, %v4414_v49 }
 0x60d   :  { %3778 = vtanh.f32 %v1803_v21  ;;  %v1802_v23 = vadd.f32 %v1800_v22, %v1798_v20  ;;  %v1806_v28 = vsub.f32 1.0, %v3777_v25  ;;  %v1810_v36 = vmul.f32 %v3777_v25, %v4416_v50  ;;  %v2048_v50 = vld [vmem:[#allocation3 + $0x60] sm:$0xff] }
 0x60f   :  { %3780 = vtanh.f32 %v1802_v23 }
 0x61a   :  { %v3779_v27 = vpop.eup %3778 }
 0x61b   :  { %v1809_v29 = vmul.f32 %v3779_v27, %v1807_v26 }
 0x61c   :  { %v3781_v31 = vpop.eup %3780 }
 0x61d   :  { %v1808_v32 = vmul.f32 %v3781_v31, %v1806_v28  ;;  %v4464_v33 = vadd.f32 %v1811_v30, %v1809_v29 }
 0x61f   :  { %v4466_v34 = vadd.f32 %v1810_v36, %v1808_v32  ;;  %1815 = vst.msk [vmem:[#allocation2 + $0x58] sm:$0xff] %vm114_vm0, %v4464_v33  ;;  %v2402_v36 = vld [vmem:[%s4795_s6 + $0x10] sm:$0xff] }
 0x621   :  { %1814 = vst.msk [vmem:[#allocation2 + $0x50] sm:$0xff] %vm114_vm0, %v4466_v34  ;;  %3537 = vmatprep.mubr.msk.f32.mxu0 %vm114_vm0, %v4466_v34  ;;  %3548 = vmatprep.mubr.msk.f32.mxu1 %vm114_vm0, %v4466_v34 }
 0x622   :  { %3538 = vmatmul.mubr.msk.f32.vlgmr.msra.gmra.mxu0 %vm114_vm0, %v4464_v33  ;;  %3549 = vmatmul.mubr.msk.f32.vlgmr.msra.gmra.mxu1 %vm114_vm0, %v4464_v33 }
 0x623   :  { %3552 = vmatpush3.msra.mxu0 %v4480_v35  ;;  %3559 = vmatprep.mubr.msk.f32.mxu0 %vm114_vm0, %v4466_v34 }
 0x624   :  { %3553 = vmatprep.subr.mxu0 %v4485_v37  ;;  %3563 = vmatpush3.msra.mxu1 %v4457_v0 }
 0x625   :  { %3554 = vmatpush3.msra.mxu0 %v4485_v37  ;;  %3564 = vmatprep.subr.mxu1 %v3921_v38 }
 0x626   :  { %3555 = vmatprep.subr.mxu0 %v4490_v39  ;;  %3565 = vmatpush3.msra.mxu1 %v3921_v38  ;;  %v2385_v38 = vld [vmem:[#allocation2 + $0x8] sm:$0xff] }
 0x627   :  { %3556 = vmatpush3.msra.mxu0 %v4490_v39  ;;  %3566 = vmatprep.subr.mxu1 %v3923_v40 }
 0x628   :  { %3557 = vmatprep.subr.mxu0 %v4494_v41  ;;  %3567 = vmatpush3.msra.mxu1 %v3923_v40  ;;  %v2387_v40 = vld [vmem:[#allocation2 + $0x18] sm:$0xff] }
 0x629   :  { %3558 = vmatpush3.msra.mxu0 %v4494_v41  ;;  %3568 = vmatprep.subr.mxu1 %v3925_v42 }
 0x62a   :  { %3560 = vmatmul.mubr.msk.f32.vlgmr.msra.gmra.mxu0 %vm114_vm0, %v4464_v33  ;;  %3573 = vmatprep.subr.mxu0 %v3926_v43 }
 0x62b   :  { %3574 = vmatpush3.msra.mxu0 %v3926_v43  ;;  %3569 = vmatpush3.msra.mxu1 %v3925_v42  ;;  %v2389_v42 = vld [vmem:[#allocation2 + $0x28] sm:$0xff]  ;;  %v2391_v43 = vld [vmem:[#allocation2 + $0x38] sm:$0xff] }
 0x62c   :  { %3575 = vmatprep.subr.mxu0 %v3927_v44  ;;  %3584 = vmatprep.subr.mxu1 %v4480_v35 }
 0x62d   :  { %3576 = vmatpush3.msra.mxu0 %v3927_v44  ;;  %v2392_v44 = vld [vmem:[#allocation2 + $0x40] sm:$0xff] }
 0x62e   :  { %3577 = vmatprep.subr.mxu0 %v3928_v45 }
 0x62f   :  { %3578 = vmatpush3.msra.mxu0 %v3928_v45  ;;  %v2393_v45 = vld [vmem:[#allocation2 + $0x48] sm:$0xff] }
 0x630   :  { %3579 = vmatprep.subr.mxu0 %v3929_v46 }
 0x631   :  { %3580 = vmatpush3.msra.mxu0 %v3929_v46  ;;  %v2394_v46 = vld [vmem:[#allocation2 + $0x50] sm:$0xff] }
 0x632   :  { %3595 = vmatprep.subr.mxu0 %v4504_v47 }
 0x6e2   :  { %v3539_v49 = vpop.f32.mrf.mxu0  ;;  %v3550_v1 = vpop.f32.mrf.mxu1 }
 0x6e3   :  { %v2051_v0 = vadd.f32 %v3539_v49, %v2049_v48  ;;  %v2068_v13 = vadd.f32 %v3550_v1, %v2066_v11  ;;  %v2333_v1 = vld [vmem:[#allocation3 + $0x78] sm:$0xff] }
 0x6e4   :  { %v1888_v3 = vpop.f32.mrf.mxu0  ;;  %v1963_v12 = vpop.f32.mrf.mxu1 }
 0x6e5   :  { %v3102_v4 = vmul.f32 -1.442695, %v2051_v0  ;;  %v2050_v6 = vadd.f32 %v2048_v50, %v1888_v3  ;;  %v2067_v51 = vadd.f32 %v2065_v5, %v1963_v12  ;;  %v3104_v7 = vmul.f32 -1.442695, %v2068_v13  ;;  %v2621_v50 = vld [vmem:[%s4797_s8 + $0x8] sm:$0xff]  ;;  %v2620_v0 = vld [vmem:[%s4797_s8] sm:$0xff] }
 0x6e7   :  { %3782 = vpow2.f32 %v3102_v4  ;;  %v3101_v10 = vmul.f32 -1.442695, %v2050_v6  ;;  %v3103_v52 = vmul.f32 -1.442695, %v2067_v51  ;;  %v2332_v4 = vld [vmem:[#allocation3 + $0x70] sm:$0xff] }
 0x6e9   :  { %3784 = vpow2.f32 %v3101_v10  ;;  %v2350_v10 = vld [vmem:[#allocation6 + $0x78] sm:$0xff] }
 0x6ea   :  { %3786 = vpow2.f32 %v3104_v7  ;;  %v3561_v57 = vpop.f32.mrf.mxu0 }
 0x6eb   :  { %3788 = vpow2.f32 %v3103_v52  ;;  %v2044_v63 = vadd.f32 %v4510_v62, %v3561_v57 }
 0x6ec   :  { %v2038_v60 = vpop.f32.mrf.mxu0 }
 0x6ed   :  { %v2039_v15 = vadd.f32 %v4510_v62, %v2038_v60 }
 0x6f4   :  { %v3783_v53 = vpop.eup %3782 }
 0x6f5   :  { %v2059_v9 = vadd.f32 1.0, %v3783_v53  ;;  %v2349_v53 = vld [vmem:[#allocation6 + $0x70] sm:$0xff] }
 0x6f6   :  { %v3785_v54 = vpop.eup %3784 }
 0x6f7   :  { %3790 = vrcp.f32 %v2059_v9  ;;  %v2058_v55 = vadd.f32 1.0, %v3785_v54  ;;  %v3787_v56 = vpop.eup %3786  ;;  %v4576_v54 = vld [vmem:[%s4796_s7] ss:$0 sm:$0xff] }
 0x6f8   :  { %v3789_v58 = vpop.eup %3788  ;;  %v2076_v59 = vadd.f32 1.0, %v3787_v56 }
 0x6f9   :  { %3792 = vrcp.f32 %v2058_v55  ;;  %v2075_v61 = vadd.f32 1.0, %v3789_v58 }
 0x6fa   :  { %3794 = vrcp.f32 %v2076_v59 }
 0x6fb   :  { %3796 = vrcp.f32 %v2075_v61 }
 0x704   :  { %v3791_v2 = vpop.eup %3790 }
 0x705   :  { %v2085_v14 = vmul.f32 %v3791_v2, %v2044_v63 }
 0x706   :  { %v3793_v16 = vpop.eup %3792 }
 0x707   :  { %v2087_v18 = vadd.f32 %v2085_v14, %v2083_v8  ;;  %v2084_v19 = vmul.f32 %v3793_v16, %v2039_v15  ;;  %v3795_v21 = vpop.eup %3794 }
 0x708   :  { %v3797_v22 = vpop.eup %3796  ;;  %v2091_v23 = vsub.f32 1.0, %v3795_v21  ;;  %v2095_v27 = vmul.f32 %v3795_v21, %v4464_v33  ;;  %v2384_v33 = vld [vmem:[#allocation2] sm:$0xff] }
 0x709   :  { %3798 = vtanh.f32 %v2087_v18  ;;  %v2086_v20 = vadd.f32 %v2084_v19, %v2082_v17  ;;  %v2090_v25 = vsub.f32 1.0, %v3797_v22  ;;  %v2094_v30 = vmul.f32 %v3797_v22, %v4466_v34  ;;  %v2401_v34 = vld [vmem:[%s4795_s6 + $0x8] sm:$0xff] }
 0x70b   :  { %3800 = vtanh.f32 %v2086_v20 }
 0x716   :  { %v3799_v24 = vpop.eup %3798 }
 0x717   :  { %v2093_v26 = vmul.f32 %v3799_v24, %v2091_v23 }
 0x718   :  { %v3801_v28 = vpop.eup %3800 }
 0x719   :  { %v2092_v29 = vmul.f32 %v3801_v28, %v2090_v25  ;;  %v4516_v31 = vadd.f32 %v2095_v27, %v2093_v26 }
 0x71b   :  { %v4518_v32 = vadd.f32 %v2094_v30, %v2092_v29  ;;  %2099 = vst.msk [vmem:[#allocation2 + $0x68] sm:$0xff] %vm114_vm0, %v4516_v31 }
 0x71d   :  { %2098 = vst.msk [vmem:[#allocation2 + $0x60] sm:$0xff] %vm114_vm0, %v4518_v32  ;;  %3570 = vmatprep.mubr.msk.f32.mxu1 %vm114_vm0, %v4518_v32  ;;  %3581 = vmatprep.mubr.msk.f32.mxu0 %vm114_vm0, %v4518_v32 }
 0x71e   :  { %3571 = vmatmul.mubr.msk.f32.vlgmr.msra.gmra.mxu1 %vm114_vm0, %v4516_v31  ;;  %3582 = vmatmul.mubr.msk.f32.vlgmr.msra.gmra.mxu0 %vm114_vm0, %v4516_v31 }
 0x71f   :  { %3585 = vmatpush3.msra.mxu1 %v4480_v35  ;;  %3596 = vmatpush3.msra.mxu0 %v4504_v47  ;;  %v2400_v35 = vld [vmem:[%s4795_s6] sm:$0xff]  ;;  %v2395_v47 = vld [vmem:[#allocation2 + $0x58] sm:$0xff] }
 0x720   :  { %3586 = vmatprep.subr.mxu1 %v4485_v37  ;;  %3592 = vmatprep.mubr.msk.f32.mxu1 %vm114_vm0, %v4518_v32 }
 0x721   :  { %3597 = vmatprep.subr.mxu0 %v2402_v36  ;;  %3603 = vmatprep.mubr.msk.f32.mxu0 %vm114_vm0, %v2384_v33 }
 0x722   :  { %3587 = vmatpush3.msra.mxu1 %v4485_v37  ;;  %3598 = vmatpush3.msra.mxu0 %v2402_v36  ;;  %v2386_v37 = vld [vmem:[#allocation2 + $0x10] sm:$0xff]  ;;  %v2397_v49 = vld [vmem:[#allocation2 + $0x68] sm:$0xff] }
 0x723   :  { %3588 = vmatprep.subr.mxu1 %v4490_v39  ;;  %3599 = vmatprep.subr.mxu0 %v2401_v34 }
 0x724   :  { %3589 = vmatpush3.msra.mxu1 %v4490_v39  ;;  %3600 = vmatpush3.msra.mxu0 %v2401_v34  ;;  %v2388_v39 = vld [vmem:[#allocation2 + $0x20] sm:$0xff] }
 0x725   :  { %3590 = vmatprep.subr.mxu1 %v4494_v41  ;;  %3601 = vmatprep.subr.mxu0 %v2400_v35  ;;  %v2396_v48 = vld [vmem:[#allocation2 + $0x60] sm:$0xff] }
 0x726   :  { %3591 = vmatpush3.msra.mxu1 %v4494_v41  ;;  %3602 = vmatpush3.msra.mxu0 %v2400_v35  ;;  %v2390_v41 = vld [vmem:[#allocation2 + $0x30] sm:$0xff] }
 0x727   :  { %3593 = vmatmul.mubr.msk.f32.vlgmr.msra.gmra.mxu1 %vm114_vm0, %v4516_v31  ;;  %3604 = vmatmul.mubr.msk.f32.vlgmr.msra.gmra.mxu0 %vm114_vm0, %v2385_v38 }
 0x728   :  { %3606 = vmatprep.mubr.msk.f32.mxu0 %vm114_vm0, %v2386_v37  ;;  %3627 = vmatprep.subr.mxu1 %v2621_v50 }
 0x729   :  { %3628 = vmatpush3.msra.mxu1 %v2621_v50 }
 0x72a   :  { %3629 = vmatprep.subr.mxu1 %v2620_v0 }
 0x72b   :  { %3607 = vmatmul.mubr.msk.f32.gmra.mxu0 %vm114_vm0, %v2387_v40  ;;  %3630 = vmatpush3.msra.mxu1 %v2620_v0 }
 0x72c   :  { %3609 = vmatprep.mubr.msk.f32.mxu0 %vm114_vm0, %v2388_v39 }
 0x72f   :  { %3610 = vmatmul.mubr.msk.f32.gmra.mxu0 %vm114_vm0, %v2389_v42 }
 0x730   :  { %3612 = vmatprep.mubr.msk.f32.mxu0 %vm114_vm0, %v2390_v41 }
 0x733   :  { %3613 = vmatmul.mubr.msk.f32.gmra.mxu0 %vm114_vm0, %v2391_v43 }
 0x734   :  { %3615 = vmatprep.mubr.msk.f32.mxu0 %vm114_vm0, %v2392_v44 }
 0x737   :  { %3616 = vmatmul.mubr.msk.f32.gmra.mxu0 %vm114_vm0, %v2393_v45 }
 0x738   :  { %3618 = vmatprep.mubr.msk.f32.mxu0 %vm114_vm0, %v2394_v46 }
 0x73b   :  { %3619 = vmatmul.mubr.msk.f32.gmra.mxu0 %vm114_vm0, %v2395_v47 }
 0x73c   :  { %3621 = vmatprep.mubr.msk.f32.mxu0 %vm114_vm0, %v2396_v48 }
 0x73f   :  { %3622 = vmatmul.mubr.msk.f32.gmra.mxu0 %vm114_vm0, %v2397_v49  ;;  %v2367_v49 = vld [vmem:[#allocation8 + $0x78] sm:$0xff] }
 0x7de   :  { %v3572_v3 = vpop.f32.mrf.mxu1  ;;  %v3583_v11 = vpop.f32.mrf.mxu0 }
 0x7df   :  { %v2335_v6 = vadd.f32 %v3572_v3, %v2333_v1  ;;  %v2352_v51 = vadd.f32 %v3583_v11, %v2350_v10 }
 0x7e0   :  { %v2172_v12 = vpop.f32.mrf.mxu1  ;;  %v2247_v52 = vpop.f32.mrf.mxu0 }
 0x7e1   :  { %v3112_v5 = vmul.f32 -1.442695, %v2335_v6  ;;  %v2334_v13 = vadd.f32 %v2332_v4, %v2172_v12  ;;  %v2351_v9 = vadd.f32 %v2349_v53, %v2247_v52  ;;  %v3114_v55 = vmul.f32 -1.442695, %v2352_v51  ;;  %v2366_v4 = vld [vmem:[#allocation8 + $0x70] sm:$0xff] }
 0x7e3   :  { %3802 = vpow2.f32 %v3112_v5  ;;  %v3111_v7 = vmul.f32 -1.442695, %v2334_v13  ;;  %v3113_v59 = vmul.f32 -1.442695, %v2351_v9 }
 0x7e5   :  { %3804 = vpow2.f32 %v3111_v7 }
 0x7e6   :  { %3806 = vpow2.f32 %v3114_v55 }
 0x7e7   :  { %v3605_v56 = vpop.f32.mrf.mxu0  ;;  %v3594_v36 = vpop.f32.mrf.mxu1 }
 0x7e8   :  { %v2531_v57 = vadd.f32 %v3605_v56, %v4576_v54  ;;  %v2328_v45 = vadd.f32 %v4510_v62, %v3594_v36 }
 0x7e9   :  { %v2525_v58 = vpop.f32.mrf.mxu0  ;;  %v2322_v43 = vpop.f32.mrf.mxu1 }
 0x7ea   :  { %v2526_v60 = vadd.f32 %v4576_v54, %v2525_v58  ;;  %v2323_v0 = vadd.f32 %v4510_v62, %v2322_v43 }
 0x7eb   :  { %v3608_v61 = vpop.f32.mrf.mxu0 }
 0x7ec   :  { %3808 = vtanh.f32 %v2526_v60  ;;  %v2541_v63 = vadd.f32 %v3608_v61, %v4576_v54 }
 0x7ed   :  { %3810 = vtanh.f32 %v2531_v57  ;;  %v2535_v2 = vpop.f32.mrf.mxu0 }
 0x7ee   :  { %3812 = vpow2.f32 %v3113_v59  ;;  %v2536_v8 = vadd.f32 %v4576_v54, %v2535_v2 }
 0x7ef   :  { %v3611_v14 = vpop.f32.mrf.mxu0 }
 0x7f0   :  { %v3803_v15 = vpop.eup %3802  ;;  %3814 = vtanh.f32 %v2536_v8  ;;  %v2551_v22 = vadd.f32 %v3611_v14, %v4576_v54 }
 0x7f1   :  { %v2343_v16 = vadd.f32 1.0, %v3803_v15  ;;  %3816 = vtanh.f32 %v2541_v63  ;;  %v2545_v17 = vpop.f32.mrf.mxu0 }
 0x7f2   :  { %v3805_v18 = vpop.eup %3804  ;;  %v2546_v20 = vadd.f32 %v4576_v54, %v2545_v17 }
 0x7f3   :  { %3818 = vrcp.f32 %v2343_v16  ;;  %v2342_v19 = vadd.f32 1.0, %v3805_v18  ;;  %v3614_v21 = vpop.f32.mrf.mxu0  ;;  %v3807_v27 = vpop.eup %3806 }
 0x7f4   :  { %v2561_v25 = vadd.f32 %v3614_v21, %v4576_v54  ;;  %v2360_v40 = vadd.f32 1.0, %v3807_v27 }
 0x7f5   :  { %3820 = vrcp.f32 %v2342_v19  ;;  %v2555_v23 = vpop.f32.mrf.mxu0 }
 0x7f6   :  { %v2556_v24 = vadd.f32 %v4576_v54, %v2555_v23  ;;  %3822 = vtanh.f32 %v2546_v20  ;;  %v4617_v20 = vld [vmem:[%s4798_s9] ss:$0 sm:$0xff]  ;;  %s4045_s9 = smov [#allocation11]  }
 0x7f7   :  { %v3617_v26 = vpop.f32.mrf.mxu0  ;;  %3824 = vtanh.f32 %v2551_v22  ;;  %s3020_s0 = sshll.u32 %s4045_s9, 4  ;;  %s3021_s0 = int_to_ptr.vmem [resolvable:$true] %s3020_s0 }
 0x7f8   :  { %3826 = vtanh.f32 %v2556_v24  ;;  %v2571_v35 = vadd.f32 %v3617_v26, %v4576_v54  ;;  %s4011_s11 = scalar_lea.vmem %s3021_s0, 2048  ;;  %p4016_p7 = scmp.lt.s32.totalorder %s3021_s0, %s3021_s0 }
 0x7f9   :  { %v3809_v28 = vpop.eup %3808  ;;  %v2565_v29 = vpop.f32.mrf.mxu0  ;;  %3828 = vtanh.f32 %v2561_v25  ;;  %p4012_p6 = scmp.ne.s32.totalorder %s3021_s0, %s4011_s11  ;;  %p4017_p8 = scmp.lt.s32.totalorder %s4011_s11, %s4011_s11 }
 0x7fa   :  { %v3811_v30 = vpop.eup %3810  ;;  %v2566_v33 = vadd.f32 %v4576_v54, %v2565_v29  ;;  %3631 = vmatprep.mubr.msk.f32.mxu1 %vm2629_vm1, %v3809_v28 }
 0x7fb   :  { %v3813_v34 = vpop.eup %3812  ;;  %v3620_v38 = vpop.f32.mrf.mxu0  ;;  %3632 = vmatmul.mubr.msk.f32.vlgmr.msra.gmra.mxu1 %vm2629_vm1, %v3811_v30  ;;  %p4018_p9 = por %p4017_p8, %p4016_p7 }
 0x7fc   :  { %3830 = vtanh.f32 %v2566_v33  ;;  %v2359_v41 = vadd.f32 1.0, %v3813_v34  ;;  %v2581_v46 = vadd.f32 %v3620_v38, %v4576_v54 }
 0x7fd   :  { %v3815_v37 = vpop.eup %3814  ;;  %v2575_v39 = vpop.f32.mrf.mxu0  ;;  %3832 = vtanh.f32 %v2571_v35  ;;  %p4019_p10 = pnand %p4018_p9, %p4012_p6 }
 0x7fe   :  { %v3817_v42 = vpop.eup %3816  ;;  %v2576_v44 = vadd.f32 %v4576_v54, %v2575_v39  ;;  %3634 = vmatprep.mubr.msk.f32.mxu1 %vm2629_vm1, %v3815_v37 }
 0x7ff   :  { %v3623_v47 = vpop.f32.mrf.mxu0  ;;  %3635 = vmatmul.mubr.msk.f32.gmra.mxu1 %vm2629_vm1, %v3817_v42 }
 0x800   :  { %v3819_v48 = vpop.eup %3818  ;;  %3834 = vtanh.f32 %v2576_v44  ;;  %v2591_v5 = vadd.f32 %v3623_v47, %v4576_v54 }
 0x801   :  { %3836 = vrcp.f32 %v2360_v40  ;;  %v2369_v50 = vmul.f32 %v3819_v48, %v2328_v45  ;;  %v2585_v1 = vpop.f32.mrf.mxu0 }
 0x802   :  { %v3821_v3 = vpop.eup %3820  ;;  %3838 = vrcp.f32 %v2359_v41  ;;  %v2586_v6 = vadd.f32 %v4576_v54, %v2585_v1 }
 0x803   :  { %v2371_v11 = vadd.f32 %v2369_v50, %v2367_v49  ;;  %v2368_v10 = vmul.f32 %v3821_v3, %v2323_v0  ;;  %3840 = vtanh.f32 %v2581_v46  ;;  %v3823_v12 = vpop.eup %3822 }
 0x804   :  { %3842 = vtanh.f32 %v2586_v6  ;;  %v3825_v13 = vpop.eup %3824  ;;  %3637 = vmatprep.mubr.msk.f32.mxu1 %vm2629_vm1, %v3823_v12 }
 0x805   :  { %3844 = vtanh.f32 %v2371_v11  ;;  %v2370_v51 = vadd.f32 %v2368_v10, %v2366_v4  ;;  %v3827_v7 = vpop.eup %3826  ;;  %3638 = vmatmul.mubr.msk.f32.gmra.mxu1 %vm2629_vm1, %v3825_v13 }
 0x806   :  { %3640 = vmatprep.mubr.msk.f32.mxu1 %vm2629_vm1, %v3827_v7  ;;  %v3829_v62 = vpop.eup %3828 }
 0x807   :  { %3846 = vtanh.f32 %v2370_v51 }
 0x808   :  { %3848 = vtanh.f32 %v2591_v5 }
 0x809   :  { %v3831_v52 = vpop.eup %3830  ;;  %3641 = vmatmul.mubr.msk.f32.gmra.mxu1 %vm2629_vm1, %v3829_v62 }
 0x80a   :  { %3643 = vmatprep.mubr.msk.f32.mxu1 %vm2629_vm1, %v3831_v52  ;;  %v3833_v53 = vpop.eup %3832 }
 0x80d   :  { %v3835_v9 = vpop.eup %3834  ;;  %3644 = vmatmul.mubr.msk.f32.gmra.mxu1 %vm2629_vm1, %v3833_v53 }
 0x80e   :  { %v3837_v55 = vpop.eup %3836  ;;  %3646 = vmatprep.mubr.msk.f32.mxu1 %vm2629_vm1, %v3835_v9 }
 0x80f   :  { %v3839_v56 = vpop.eup %3838  ;;  %v2375_v59 = vsub.f32 1.0, %v3837_v55  ;;  %v2379_v61 = vmul.f32 %v3837_v55, %v4516_v31 }
 0x810   :  { %v3841_v57 = vpop.eup %3840  ;;  %v2374_v63 = vsub.f32 1.0, %v3839_v56  ;;  %v2378_v15 = vmul.f32 %v3839_v56, %v4518_v32 }
 0x811   :  { %v3843_v58 = vpop.eup %3842  ;;  %3647 = vmatmul.mubr.msk.f32.gmra.mxu1 %vm2629_vm1, %v3841_v57 }
 0x812   :  { %v3845_v60 = vpop.eup %3844  ;;  %3649 = vmatprep.mubr.msk.f32.mxu1 %vm2629_vm1, %v3843_v58 }
 0x813   :  { %v2377_v2 = vmul.f32 %v3845_v60, %v2375_v59 }
 0x814   :  { %v3847_v8 = vpop.eup %3846 }
 0x815   :  { %v3849_v14 = vpop.eup %3848  ;;  %v2381_v16 = vadd.f32 %v2379_v61, %v2377_v2  ;;  %v2376_v17 = vmul.f32 %v3847_v8, %v2374_v63 }
 0x816   :  { %3650 = vmatmul.mubr.msk.f32.gmra.mxu1 %vm2629_vm1, %v3849_v14 }
 0x817   :  { %2383 = vst.msk [vmem:[#allocation2 + $0x78] sm:$0xff] %vm114_vm0, %v2381_v16  ;;  %v2380_v18 = vadd.f32 %v2378_v15, %v2376_v17 }
 0x819   :  { %2382 = vst.msk [vmem:[#allocation2 + $0x70] sm:$0xff] %vm114_vm0, %v2380_v18 }
 0x81e   :  { %v2399_v31 = vld [vmem:[#allocation2 + $0x78] sm:$0xff] }
 0x820   :  { %v2398_v19 = vld [vmem:[#allocation2 + $0x70] sm:$0xff] }
 0x821   :  { %3624 = vmatprep.mubr.msk.f32.mxu0 %vm114_vm0, %v2398_v19 }
 0x822   :  { %3625 = vmatmul.mubr.msk.f32.gmra.mxu0 %vm114_vm0, %v2399_v31 }
 0x8bb   :  { %v3633_v32 = vpop.f32.mrf.mxu1 }
 0x8bc   :  { %v4620_v21 = vadd.f32 %v3633_v32, %v4617_v20 }
 0x8bd   :  { %v2744_v22 = vpop.f32.mrf.mxu1 }
 0x8be   :  { %2825 = vmax.xlane.f32.xlu0 %v4620_v21  ;;  %v4624_v24 = vadd.f32 %v4617_v20, %v2744_v22 }
 0x8bf   :  { %v3636_v23 = vpop.f32.mrf.mxu1 }
 0x8c0   :  { %v4627_v25 = vadd.f32 %v3636_v23, %v4617_v20 }
 0x8c1   :  { %v2754_v26 = vpop.f32.mrf.mxu1 }
 0x8c2   :  { %2829 = vmax.xlane.f32.xlu1 %v4627_v25  ;;  %2823 = vmax.xlane.f32.xlu0 %v4624_v24  ;;  %v4632_v27 = vadd.f32 %v4617_v20, %v2754_v26 }
 0x8c5   :  { %v3639_v28 = vpop.f32.mrf.mxu1 }
 0x8c6   :  { %2827 = vmax.xlane.f32.xlu1 %v4632_v27  ;;  %v4636_v29 = vadd.f32 %v3639_v28, %v4617_v20 }
 0x8c7   :  { %v2764_v30 = vpop.f32.mrf.mxu1 }
 0x8c8   :  { %v4639_v36 = vadd.f32 %v4617_v20, %v2764_v30 }
 0x8c9   :  { %v3642_v33 = vpop.f32.mrf.mxu1 }
 0x8ca   :  { %2833 = vmax.xlane.f32.xlu1 %v4636_v29  ;;  %2831 = vmax.xlane.f32.xlu0 %v4639_v36  ;;  %v4644_v34 = vadd.f32 %v3642_v33, %v4617_v20 }
 0x8cb   :  { %v2774_v35 = vpop.f32.mrf.mxu1 }
 0x8cc   :  { %v4647_v38 = vadd.f32 %v4617_v20, %v2774_v35 }
 0x8cd   :  { %v3645_v37 = vpop.f32.mrf.mxu1 }
 0x8ce   :  { %2837 = vmax.xlane.f32.xlu1 %v4644_v34  ;;  %2835 = vmax.xlane.f32.xlu0 %v4647_v38  ;;  %v4652_v40 = vadd.f32 %v3645_v37, %v4617_v20 }
 0x8cf   :  { %v2784_v39 = vpop.f32.mrf.mxu1 }
 0x8d0   :  { %v4655_v42 = vadd.f32 %v4617_v20, %v2784_v39 }
 0x8d1   :  { %v3648_v41 = vpop.f32.mrf.mxu1 }
 0x8d2   :  { %2841 = vmax.xlane.f32.xlu1 %v4652_v40  ;;  %2839 = vmax.xlane.f32.xlu0 %v4655_v42  ;;  %v4660_v43 = vadd.f32 %v3648_v41, %v4617_v20 }
 0x8d3   :  { %v2794_v44 = vpop.f32.mrf.mxu1 }
 0x8d4   :  { %v4663_v45 = vadd.f32 %v4617_v20, %v2794_v44 }
 0x8d6   :  { %v3651_v46 = vpop.f32.mrf.mxu1  ;;  %2845 = vmax.xlane.f32.xlu1 %v4660_v43  ;;  %2843 = vmax.xlane.f32.xlu0 %v4663_v45 }
 0x8d7   :  { %v4668_v47 = vadd.f32 %v3651_v46, %v4617_v20 }
 0x8d8   :  { %v2804_v48 = vpop.f32.mrf.mxu1 }
 0x8d9   :  { %v4671_v49 = vadd.f32 %v4617_v20, %v2804_v48 }
 0x8da   :  { %2849 = vmax.xlane.f32.xlu1 %v4668_v47 }
 0x8db   :  { %2847 = vmax.xlane.f32.xlu0 %v4671_v49 }
 0x8e2   :  { %v3626_v50 = vpop.f32.mrf.mxu0 }
 0x8e3   :  { %v2601_v0 = vadd.f32 %v3626_v50, %v4576_v54 }
 0x8e4   :  { %v2595_v1 = vpop.f32.mrf.mxu0 }
 0x8e5   :  { %v2596_v3 = vadd.f32 %v4576_v54, %v2595_v1 }
 0x8e7   :  { %3850 = vtanh.f32 %v2596_v3 }
 0x8e8   :  { %3852 = vtanh.f32 %v2601_v0 }
 0x8f4   :  { %v3851_v4 = vpop.eup %3850 }
 0x8f5   :  { %v3853_v6 = vpop.eup %3852  ;;  %3652 = vmatprep.mubr.msk.f32.mxu1 %vm2629_vm1, %v3851_v4 }
 0x8f6   :  { %3653 = vmatmul.mubr.msk.f32.gmra.mxu1 %vm2629_vm1, %v3853_v6 }
 0x947   :  { %v4681_v10 = vpop.xlane.xlu0 %2825 }
 0x948   :  { %v2856_v54 = vsub.f32 %v4620_v21, %v4681_v10 }
 0x94a   :  { %v2873_v52 = vmul.f32 1.442695, %v2856_v54 }
 0x94b   :  { %v4679_v11 = vpop.xlane.xlu1 %2829  ;;  %v4685_v5 = vpop.xlane.xlu0 %2823 }
 0x94c   :  { %v2855_v7 = vsub.f32 %v4624_v24, %v4685_v5  ;;  %v2858_v53 = vsub.f32 %v4627_v25, %v4679_v11  ;;  %3854 = vpow2.f32 %v2873_v52 }
 0x94e   :  { %v2871_v55 = vmul.f32 1.442695, %v2855_v7  ;;  %v2877_v57 = vmul.f32 1.442695, %v2858_v53 }
 0x94f   :  { %v4683_v12 = vpop.xlane.xlu1 %2827 }
 0x950   :  { %v2857_v56 = vsub.f32 %v4632_v27, %v4683_v12  ;;  %3856 = vpow2.f32 %v2871_v55 }
 0x951   :  { %3858 = vpow2.f32 %v2877_v57 }
 0x952   :  { %v2875_v60 = vmul.f32 1.442695, %v2857_v56 }
 0x953   :  { %v4687_v13 = vpop.xlane.xlu1 %2833  ;;  %v4689_v51 = vpop.xlane.xlu0 %2831 }
 0x954   :  { %v2860_v58 = vsub.f32 %v4636_v29, %v4687_v13  ;;  %v2859_v61 = vsub.f32 %v4639_v36, %v4689_v51  ;;  %3860 = vpow2.f32 %v2875_v60 }
 0x956   :  { %v2881_v2 = vmul.f32 1.442695, %v2860_v58  ;;  %v2879_v14 = vmul.f32 1.442695, %v2859_v61 }
 0x957   :  { %v4695_v62 = vpop.xlane.xlu1 %2837  ;;  %v4699_v9 = vpop.xlane.xlu0 %2835 }
 0x958   :  { %v2862_v8 = vsub.f32 %v4644_v34, %v4695_v62  ;;  %v2861_v15 = vsub.f32 %v4647_v38, %v4699_v9  ;;  %3862 = vpow2.f32 %v2881_v2 }
 0x959   :  { %3864 = vpow2.f32 %v2879_v14  ;;  %v3855_v35 = vpop.eup %3854 }
 0x95a   :  { %v2885_v18 = vmul.f32 1.442695, %v2862_v8  ;;  %v2883_v23 = vmul.f32 1.442695, %v2861_v15 }
 0x95b   :  { %v4705_v59 = vpop.xlane.xlu1 %2841  ;;  %v4709_v63 = vpop.xlane.xlu0 %2839 }
 0x95c   :  { %v2864_v19 = vsub.f32 %v4652_v40, %v4705_v59  ;;  %v2863_v26 = vsub.f32 %v4655_v42, %v4709_v63  ;;  %3866 = vpow2.f32 %v2885_v18 }
 0x95d   :  { %3868 = vpow2.f32 %v2883_v23 }
 0x95e   :  { %v2889_v30 = vmul.f32 1.442695, %v2864_v19  ;;  %v2887_v39 = vmul.f32 1.442695, %v2863_v26 }
 0x95f   :  { %v4715_v16 = vpop.xlane.xlu1 %2845  ;;  %v4722_v32 = vpop.xlane.xlu0 %2843 }
 0x960   :  { %v2866_v33 = vsub.f32 %v4660_v43, %v4715_v16  ;;  %v2865_v41 = vsub.f32 %v4663_v45, %v4722_v32  ;;  %3870 = vpow2.f32 %v2889_v30 }
 0x961   :  { %3872 = vpow2.f32 %v2887_v39 }
 0x962   :  { %v2893_v46 = vmul.f32 1.442695, %v2866_v33  ;;  %v2891_v0 = vmul.f32 1.442695, %v2865_v41 }
 0x963   :  { %v4733_v37 = vpop.xlane.xlu1 %2849 }
 0x964   :  { %v4737_v44 = vpop.xlane.xlu0 %2847  ;;  %v2868_v48 = vsub.f32 %v4668_v47, %v4733_v37  ;;  %3874 = vpow2.f32 %v2893_v46 }
 0x965   :  { %v2867_v1 = vsub.f32 %v4671_v49, %v4737_v44  ;;  %3876 = vpow2.f32 %v2891_v0 }
 0x966   :  { %v2897_v4 = vmul.f32 1.442695, %v2868_v48 }
 0x967   :  { %v2895_v54 = vmul.f32 1.442695, %v2867_v1 }
 0x968   :  { %3878 = vpow2.f32 %v2897_v4 }
 0x969   :  { %3880 = vpow2.f32 %v2895_v54 }
 0x9b6   :  { %v3654_v17 = vpop.f32.mrf.mxu1 }
 0x9b7   :  { %v4720_v31 = vadd.f32 %v3654_v17, %v4617_v20 }
 0x9b8   :  { %v2814_v22 = vpop.f32.mrf.mxu1 }
 0x9b9   :  { %v4727_v28 = vadd.f32 %v4617_v20, %v2814_v22  ;;  %2853 = vmax.xlane.f32.xlu1 %v4720_v31  ;;  %v3857_v20 = vpop.eup %3856 }
 0x9ba   :  { %v3859_v50 = vpop.eup %3858 }
 0x9bb   :  { %2851 = vmax.xlane.f32.xlu0 %v4727_v28  ;;  %v3861_v3 = vpop.eup %3860 }
 0x9bc   :  { %v3863_v6 = vpop.eup %3862 }
 0x9bd   :  { %2905 = vadd.xlane.f32.xlu1 %v3855_v35  ;;  %v3865_v7 = vpop.eup %3864 }
 0x9be   :  { %v3867_v52 = vpop.eup %3866 }
 0x9bf   :  { %2903 = vadd.xlane.f32.xlu0 %v3857_v20  ;;  %v3869_v53 = vpop.eup %3868 }
 0x9c0   :  { %v3871_v55 = vpop.eup %3870 }
 0x9c1   :  { %2909 = vadd.xlane.f32.xlu1 %v3859_v50  ;;  %v3873_v56 = vpop.eup %3872 }
 0x9c2   :  { %v3875_v57 = vpop.eup %3874 }
 0x9c3   :  { %2907 = vadd.xlane.f32.xlu0 %v3861_v3  ;;  %v3877_v58 = vpop.eup %3876 }
 0x9c4   :  { %v3879_v60 = vpop.eup %3878 }
 0x9c5   :  { %2913 = vadd.xlane.f32.xlu1 %v3863_v6  ;;  %v3881_v61 = vpop.eup %3880 }
 0x9c7   :  { %2911 = vadd.xlane.f32.xlu0 %v3865_v7 }
 0x9c9   :  { %2917 = vadd.xlane.f32.xlu1 %v3867_v52 }
 0x9cb   :  { %2915 = vadd.xlane.f32.xlu0 %v3869_v53 }
 0x9cd   :  { %2921 = vadd.xlane.f32.xlu1 %v3871_v55 }
 0x9cf   :  { %2919 = vadd.xlane.f32.xlu0 %v3873_v56 }
 0x9d1   :  { %2925 = vadd.xlane.f32.xlu1 %v3875_v57 }
 0x9d3   :  { %2923 = vadd.xlane.f32.xlu0 %v3877_v58 }
 0x9d5   :  { %2929 = vadd.xlane.f32.xlu1 %v3879_v60 }
 0x9d7   :  { %2927 = vadd.xlane.f32.xlu0 %v3881_v61 }
 0xa42   :  { %v4743_v2 = vpop.xlane.xlu1 %2853 }
 0xa43   :  { %v2870_v8 = vsub.f32 %v4720_v31, %v4743_v2 }
 0xa44   :  { %v4747_v14 = vpop.xlane.xlu0 %2851 }
 0xa45   :  { %v2901_v15 = vmul.f32 1.442695, %v2870_v8  ;;  %v2869_v17 = vsub.f32 %v4727_v28, %v4747_v14 }
 0xa46   :  { %v2906_v18 = vpop.xlane.xlu1 %2905 }
 0xa47   :  { %3882 = vpow2.f32 %v2901_v15  ;;  %v2899_v19 = vmul.f32 1.442695, %v2869_v17 }
 0xa48   :  { %3884 = vlog2.f32 %v2906_v18  ;;  %v2904_v22 = vpop.xlane.xlu0 %2903 }
 0xa49   :  { %3886 = vpow2.f32 %v2899_v19 }
 0xa4a   :  { %3888 = vlog2.f32 %v2904_v22  ;;  %v2910_v23 = vpop.xlane.xlu1 %2909 }
 0xa4b   :  { %3890 = vlog2.f32 %v2910_v23 }
 0xa4c   :  { %v2908_v26 = vpop.xlane.xlu0 %2907 }
 0xa4d   :  { %3892 = vlog2.f32 %v2908_v26 }
 0xa4e   :  { %v2914_v30 = vpop.xlane.xlu1 %2913 }
 0xa4f   :  { %3894 = vlog2.f32 %v2914_v30 }
 0xa50   :  { %v2912_v33 = vpop.xlane.xlu0 %2911 }
 0xa51   :  { %3896 = vlog2.f32 %v2912_v33 }
 0xa52   :  { %v2918_v35 = vpop.xlane.xlu1 %2917 }
 0xa53   :  { %3898 = vlog2.f32 %v2918_v35 }
 0xa54   :  { %v3883_v39 = vpop.eup %3882  ;;  %v2916_v41 = vpop.xlane.xlu0 %2915 }
 0xa55   :  { %v3885_v20 = vpop.eup %3884  ;;  %3900 = vlog2.f32 %v2916_v41  ;;  %2933 = vadd.xlane.f32.xlu1 %v3883_v39 }
 0xa56   :  { %v3887_v46 = vpop.eup %3886  ;;  %v2938_v48 = vmul.f32 0.6931472, %v3885_v20  ;;  %v2922_v50 = vpop.xlane.xlu1 %2921 }
 0xa57   :  { %v3889_v0 = vpop.eup %3888  ;;  %3902 = vlog2.f32 %v2922_v50  ;;  %2931 = vadd.xlane.f32.xlu0 %v3887_v46 }
 0xa58   :  { %v3891_v1 = vpop.eup %3890  ;;  %v2968_v3 = vadd.f32 %v2938_v48, %v4681_v10  ;;  %v2936_v4 = vmul.f32 0.6931472, %v3889_v0  ;;  %v2920_v6 = vpop.xlane.xlu0 %2919 }
 0xa59   :  { %v2942_v54 = vmul.f32 0.6931472, %v3891_v1  ;;  %3904 = vlog2.f32 %v2920_v6 }
 0xa5a   :  { %v3893_v7 = vpop.eup %3892  ;;  %v2984_v52 = vsub.f32 %v4620_v21, %v2968_v3  ;;  %v2967_v53 = vadd.f32 %v2936_v4, %v4685_v5  ;;  %v2926_v55 = vpop.xlane.xlu1 %2925 }
 0xa5b   :  { %v2970_v56 = vadd.f32 %v2942_v54, %v4679_v11  ;;  %v2940_v57 = vmul.f32 0.6931472, %v3893_v7  ;;  %3906 = vlog2.f32 %v2926_v55 }
 0xa5c   :  { %v3895_v58 = vpop.eup %3894  ;;  %3000 = vst [vmem:[#allocation11 + $0x8] sm:$0xff] %v2984_v52  ;;  %v2983_v60 = vsub.f32 %v4624_v24, %v2967_v53  ;;  %v2924_v61 = vpop.xlane.xlu0 %2923 }
 0xa5d   :  { %v2986_v10 = vsub.f32 %v4627_v25, %v2970_v56  ;;  %v2969_v8 = vadd.f32 %v2940_v57, %v4683_v12  ;;  %v2946_v15 = vmul.f32 0.6931472, %v3895_v58  ;;  %3908 = vlog2.f32 %v2924_v61 }
 0xa5e   :  { %v3897_v17 = vpop.eup %3896  ;;  %2999 = vst [vmem:[#allocation11] sm:$0xff] %v2983_v60  ;;  %v2930_v21 = vpop.xlane.xlu1 %2929 }
 0xa5f   :  { %3002 = vst [vmem:[#allocation11 + $0x18] sm:$0xff] %v2986_v10  ;;  %v2985_v5 = vsub.f32 %v4632_v27, %v2969_v8  ;;  %v2972_v11 = vadd.f32 %v2946_v15, %v4687_v13  ;;  %v2944_v18 = vmul.f32 0.6931472, %v3897_v17  ;;  %3910 = vlog2.f32 %v2930_v21 }
 0xa60   :  { %v3899_v19 = vpop.eup %3898  ;;  %v2928_v22 = vpop.xlane.xlu0 %2927 }
 0xa61   :  { %3001 = vst [vmem:[#allocation11 + $0x10] sm:$0xff] %v2985_v5  ;;  %v2988_v24 = vsub.f32 %v4636_v29, %v2972_v11  ;;  %v2971_v25 = vadd.f32 %v2944_v18, %v4689_v51  ;;  %v2950_v12 = vmul.f32 0.6931472, %v3899_v19  ;;  %3912 = vlog2.f32 %v2928_v22 }
 0xa62   :  { %v3901_v23 = vpop.eup %3900 }
 0xa63   :  { %3004 = vst [vmem:[#allocation11 + $0x28] sm:$0xff] %v2988_v24  ;;  %v2987_v26 = vsub.f32 %v4639_v36, %v2971_v25  ;;  %v2974_v30 = vadd.f32 %v2950_v12, %v4695_v62  ;;  %v2948_v27 = vmul.f32 0.6931472, %v3901_v23 }
 0xa64   :  { %v3903_v33 = vpop.eup %3902 }
 0xa65   :  { %3003 = vst [vmem:[#allocation11 + $0x20] sm:$0xff] %v2987_v26  ;;  %v2990_v13 = vsub.f32 %v4644_v34, %v2974_v30  ;;  %v2973_v35 = vadd.f32 %v2948_v27, %v4699_v9  ;;  %v2954_v39 = vmul.f32 0.6931472, %v3903_v33 }
 0xa66   :  { %v3905_v41 = vpop.eup %3904 }
 0xa67   :  { %3006 = vst [vmem:[#allocation11 + $0x38] sm:$0xff] %v2990_v13  ;;  %v2989_v29 = vsub.f32 %v4647_v38, %v2973_v35  ;;  %v2976_v51 = vadd.f32 %v2954_v39, %v4705_v59  ;;  %v2952_v20 = vmul.f32 0.6931472, %v3905_v41 }
 0xa68   :  { %v3907_v46 = vpop.eup %3906 }
 0xa69   :  { %3005 = vst [vmem:[#allocation11 + $0x30] sm:$0xff] %v2989_v29  ;;  %v2992_v36 = vsub.f32 %v4652_v40, %v2976_v51  ;;  %v2975_v62 = vadd.f32 %v2952_v20, %v4709_v63  ;;  %v2958_v48 = vmul.f32 0.6931472, %v3907_v46 }
 0xa6a   :  { %v3909_v50 = vpop.eup %3908 }
 0xa6b   :  { %3008 = vst [vmem:[#allocation11 + $0x48] sm:$0xff] %v2992_v36  ;;  %v2991_v34 = vsub.f32 %v4655_v42, %v2975_v62  ;;  %v2978_v9 = vadd.f32 %v2958_v48, %v4715_v16  ;;  %v2956_v0 = vmul.f32 0.6931472, %v3909_v50 }
 0xa6c   :  { %v3911_v1 = vpop.eup %3910 }
 0xa6d   :  { %3007 = vst [vmem:[#allocation11 + $0x40] sm:$0xff] %v2991_v34  ;;  %v2994_v38 = vsub.f32 %v4660_v43, %v2978_v9  ;;  %v2977_v59 = vadd.f32 %v2956_v0, %v4722_v32  ;;  %v2962_v3 = vmul.f32 0.6931472, %v3911_v1 }
 0xa6e   :  { %v3913_v4 = vpop.eup %3912 }
 0xa6f   :  { %3010 = vst [vmem:[#allocation11 + $0x58] sm:$0xff] %v2994_v38  ;;  %v2993_v40 = vsub.f32 %v4663_v45, %v2977_v59  ;;  %v2980_v63 = vadd.f32 %v2962_v3, %v4733_v37  ;;  %v2960_v6 = vmul.f32 0.6931472, %v3913_v4 }
 0xa71   :  { %3009 = vst [vmem:[#allocation11 + $0x50] sm:$0xff] %v2993_v40  ;;  %v2996_v42 = vsub.f32 %v4668_v47, %v2980_v63  ;;  %v2979_v16 = vadd.f32 %v2960_v6, %v4737_v44 }
 0xa73   :  { %3012 = vst [vmem:[#allocation11 + $0x68] sm:$0xff] %v2996_v42  ;;  %v2995_v54 = vsub.f32 %v4671_v49, %v2979_v16 }
 0xa75   :  { %3011 = vst [vmem:[#allocation11 + $0x60] sm:$0xff] %v2995_v54 }
 0xade   :  { %v2934_v43 = vpop.xlane.xlu1 %2933 }
 0xadf   :  { %3914 = vlog2.f32 %v2934_v43 }
 0xae0   :  { %v2932_v32 = vpop.xlane.xlu0 %2931 }
 0xae1   :  { %3916 = vlog2.f32 %v2932_v32 }
 0xaec   :  { %v3915_v7 = vpop.eup %3914 }
 0xaed   :  { %v2966_v52 = vmul.f32 0.6931472, %v3915_v7 }
 0xaee   :  { %v3917_v53 = vpop.eup %3916 }
 0xaef   :  { %v2982_v45 = vadd.f32 %v2966_v52, %v4743_v2  ;;  %v2964_v37 = vmul.f32 0.6931472, %v3917_v53 }
 0xaf1   :  { %v2998_v47 = vsub.f32 %v4720_v31, %v2982_v45  ;;  %v2981_v44 = vadd.f32 %v2964_v37, %v4747_v14 }
 0xaf3   :  { %3014 = vst [vmem:[#allocation11 + $0x78] sm:$0xff] %v2998_v47  ;;  %v2997_v49 = vsub.f32 %v4727_v28, %v2981_v44 }
 0xaf5   :  { %3013 = vst [vmem:[#allocation11 + $0x70] sm:$0xff] %v2997_v49 }
 0xaf6   :  { %4022 = shalt.err (!%p4019_p10)
}
 0xaf7   :  { %3026 = dma.vmem_to_hbm [thread:$0]  %s3021_s0, 2048, %s4799_s10, [#allocation5], %s4041_s18, %s4041_s18, %s4042_s19  }
 0xaf8   :  { %4037 = dma.done.wait [#allocation5], 2048  }
 0xaf9   :  { %4038 = vsyncadd [#allocation5], 4294965248 }
 0xafa   :  { %3030 = vsyncpa [#allocation4], 1 }
 0xafb   :  { %3031 = vsyncpa [#allocation7], 1 }
 0xafc   :  { %3032 = vsyncpa [#allocation10], 1 }
 0xafd   :  { %3033 = vsyncpa [#allocation5], 1 }

</bundles_post_ra>
